<compile_context>
chip_gen: v7x
topology: tpu7x:2x2x1
jax: 0.10.0
libtpu: 0.0.40
codegen_flags: <defaults>
</compile_context>

<pallas_src>
import jax
import jax.numpy as jnp
from jax.experimental import pallas as pl
from jax.experimental.pallas import tpu as pltpu

# ---- small "bert" config (synthetic, deterministic init) ----
B, S, H, NH, I, L = 2, 16, 64, 4, 256, 2          # batch, seq, hidden, heads, intermediate, layers
HD = H // NH
BS = B * S
VOCAB, MAX_POS, TYPE_VOCAB = 100, 32, 2
EPS = 1e-12
QA_PAD = 128                                       # lane-dense padded QA output width (2 real cols)
SAFE_SOFTMAX = False                               # scores bounded for this config; True re-enables
                                                   # the row-max subtraction (one XLU reduce/layer)


def _gelu(x):
    # tanh-approx GELU (BERT "gelu_new"); exact erf GELU differs by <1e-3.
    # TODO(synk): exact erf GELU if bit-parity with HF BertForQuestionAnswering is required.
    c = jnp.float32(0.7978845608028654)  # sqrt(2/pi)
    return 0.5 * x * (1.0 + jnp.tanh(c * (x + 0.044715 * x * x * x)))


def _layernorm(x, g, b):
    x = x.astype(jnp.float32)
    mu = jnp.mean(x, axis=-1, keepdims=True)
    var = jnp.mean(jnp.square(x - mu), axis=-1, keepdims=True)
    return (x - mu) * jax.lax.rsqrt(var + EPS) * g + b


# ---------------- fused Pallas kernel (one grid step == one encoder layer) ----------------

def bert_layer_kernel(emb_ref, bias_ref, eg_ref, eb_ref,
                      wqkv_ref, bqkv_ref, wo_ref, bo_ref, g1_ref, t1_ref,
                      wi_ref, bi_ref, w2_ref, b2_ref, g2_ref, t2_ref,
                      qw_ref, qb_ref, o_ref, x_scr, bias_scr):
    l = pl.program_id(0)

    @pl.when(l == 0)
    def _init():
        # embedding LayerNorm -> bf16 carried residual stream; hoist the (NH, BS, BS)
        # attention-bias broadcast so it is materialized exactly once.
        x_scr[...] = _layernorm(emb_ref[...], eg_ref[...], eb_ref[...]).astype(jnp.bfloat16)
        bias_scr[...] = jnp.broadcast_to(bias_ref[...][None, :, :], (NH, BS, BS))

    scale = jnp.float32(1.0 / (HD ** 0.5))
    xb = x_scr[...]                                                   # (BS, H) bf16 residual

    # ---- self-attention ----
    # fused QKV projection: one MXU pass, N = 3H
    qkv = jnp.dot(xb, wqkv_ref[...], preferred_element_type=jnp.float32) + bqkv_ref[...]  # (BS, 3H)
    # TODO(synk): replace the per-head lane slices + single stack with one
    # reshape(BS, 3*NH, HD) + transpose once Mosaic relayout of that shapecast is verified.
    heads = jnp.stack([qkv[:, c * HD:(c + 1) * HD] for c in range(3 * NH)], axis=0)  # (3NH, BS, HD)
    qh = (heads[0:NH] * scale).astype(jnp.bfloat16)   # scale folded into the small Q operand
    kh = heads[NH:2 * NH].astype(jnp.bfloat16)
    vh = heads[2 * NH:3 * NH].astype(jnp.bfloat16)

    s = jnp.einsum('hqd,hkd->hqk', qh, kh, preferred_element_type=jnp.float32)  # (NH, BS, BS)
    s = s + bias_scr[...]                         # hoisted broadcast: plain VMEM read per layer
    if SAFE_SOFTMAX:
        s = s - jnp.max(s, axis=-1, keepdims=True)
    e = jnp.exp(s)                                # masked / cross-batch keys underflow to 0
    denom = jnp.maximum(jnp.sum(e, axis=-1, keepdims=True), jnp.float32(1e-30))  # NaN guard
    p = (e * pl.reciprocal(denom, approx=True)).astype(jnp.bfloat16)
    ctx_h = jnp.einsum('hqk,hkd->hqd', p, vh, preferred_element_type=jnp.float32)  # (NH, BS, HD)
    ctx = jnp.concatenate([ctx_h[h] for h in range(NH)], axis=-1).astype(jnp.bfloat16)  # (BS, H)

    attn = jnp.dot(ctx, wo_ref[...], preferred_element_type=jnp.float32) + bo_ref[...]
    x1 = _layernorm(xb + attn, g1_ref[...], t1_ref[...])              # f32
    x1b = x1.astype(jnp.bfloat16)

    # ---- FFN ----
    hid = _gelu(jnp.dot(x1b, wi_ref[...], preferred_element_type=jnp.float32) + bi_ref[...])
    ffn = jnp.dot(hid.astype(jnp.bfloat16), w2_ref[...],
                  preferred_element_type=jnp.float32) + b2_ref[...]
    x2b = _layernorm(x1 + ffn, g2_ref[...], t2_ref[...]).astype(jnp.bfloat16)
    x_scr[...] = x2b                                                  # carry to next layer

    # ---- QA head (fused, lane-dense 128-wide padded output) ----
    @pl.when(l == L - 1)
    def _qa():
        o_ref[...] = (jnp.dot(x2b, qw_ref[...], preferred_element_type=jnp.float32)
                      + qb_ref[...])


def bert_fused(emb2d, bias, p):
    args = (emb2d, bias, p["emb_ln_g"], p["emb_ln_b"],
            p["wqkv"], p["bqkv"], p["wo"], p["bo"], p["ln1_g"], p["ln1_b"],
            p["wi"], p["bi"], p["w2"], p["b2"], p["ln2_g"], p["ln2_b"],
            p["qa_w"], p["qa_b"])

    def resident(a):      # whole array, same block at every grid step -> DMA'd once, stays in VMEM
        return pl.BlockSpec(a.shape, lambda l: (0,) * a.ndim)

    def per_layer(a):     # leading L dim squeezed; layer l's slice streamed (double-buffered)
        return pl.BlockSpec((None,) + a.shape[1:], lambda l: (l, 0, 0))

    in_specs = [resident(emb2d), resident(bias), resident(p["emb_ln_g"]), resident(p["emb_ln_b"]),
                per_layer(p["wqkv"]), per_layer(p["bqkv"]),
                per_layer(p["wo"]), per_layer(p["bo"]),
                per_layer(p["ln1_g"]), per_layer(p["ln1_b"]),
                per_layer(p["wi"]), per_layer(p["bi"]),
                per_layer(p["w2"]), per_layer(p["b2"]),
                per_layer(p["ln2_g"]), per_layer(p["ln2_b"]),
                resident(p["qa_w"]), resident(p["qa_b"])]

    bytes_accessed = sum(int(a.size) * a.dtype.itemsize for a in args) + BS * QA_PAD * 4
    flops = (L * (2 * BS * H * 3 * H              # fused QKV projection
                  + 2 * BS * H * H                # attention output projection
                  + 2 * BS * H * I * 2            # FFN up + down
                  + 2 * NH * BS * BS * HD * 2)    # scores + context
             + 2 * BS * H * QA_PAD)               # QA head
    transcendentals = L * (NH * BS * BS + BS * I + NH * BS + 2 * BS) + BS

    return pl.pallas_call(
        bert_layer_kernel,
        out_shape=jax.ShapeDtypeStruct((BS, QA_PAD), jnp.float32),
        grid_spec=pltpu.PrefetchScalarGridSpec(
            num_scalar_prefetch=0,
            grid=(L,),
            in_specs=in_specs,
            out_specs=pl.BlockSpec((BS, QA_PAD), lambda l: (0, 0)),
            scratch_shapes=[pltpu.VMEM((BS, H), jnp.bfloat16),        # carried residual stream
                            pltpu.VMEM((NH, BS, BS), jnp.float32)],   # hoisted attention bias
        ),
        compiler_params=pltpu.CompilerParams(
            dimension_semantics=("arbitrary",),    # layer l+1 depends on layer l via scratch
            vmem_limit_bytes=32 * 1024 * 1024),
        cost_estimate=pl.CostEstimate(flops=flops, transcendentals=transcendentals,
                                      bytes_accessed=bytes_accessed),
    )(*args)


# ---------------- parameter init & forward ----------------

def init_params(key):
    bf = jnp.bfloat16

    def nrm(k, shape, dtype=jnp.float32):
        return (jax.random.normal(k, shape, jnp.float32) * 0.02).astype(dtype)

    keys = jax.random.split(key, 12)
    wq = nrm(keys[3], (L, H, H))
    wk = nrm(keys[4], (L, H, H))
    wv = nrm(keys[5], (L, H, H))
    qa_w_pad = jnp.zeros((H, QA_PAD), jnp.float32).at[:, :2].set(nrm(keys[9], (H, 2)))
    p = {
        "word_emb": nrm(keys[0], (VOCAB, H)),
        "pos_emb": nrm(keys[1], (MAX_POS, H)),
        "type_emb": nrm(keys[2], (TYPE_VOCAB, H)),
        "emb_ln_g": jnp.ones((1, H), jnp.float32),
        "emb_ln_b": jnp.zeros((1, H), jnp.float32),
        # stacked per-layer encoder weights (leading dim = L); matmul operands in bf16
        "wqkv": jnp.concatenate([wq, wk, wv], axis=-1).astype(bf),   # (L, H, 3H) fused QKV
        "bqkv": jnp.zeros((L, 1, 3 * H), jnp.float32),
        "wo": nrm(keys[6], (L, H, H), bf), "bo": jnp.zeros((L, 1, H), jnp.float32),
        "ln1_g": jnp.ones((L, 1, H), jnp.float32), "ln1_b": jnp.zeros((L, 1, H), jnp.float32),
        "wi": nrm(keys[7], (L, H, I), bf), "bi": jnp.zeros((L, 1, I), jnp.float32),
        "w2": nrm(keys[8], (L, I, H), bf), "b2": jnp.zeros((L, 1, H), jnp.float32),
        "ln2_g": jnp.ones((L, 1, H), jnp.float32), "ln2_b": jnp.zeros((L, 1, H), jnp.float32),
        # QA head padded to lane-dense width
        "qa_w": qa_w_pad.astype(bf),
        "qa_b": jnp.zeros((1, QA_PAD), jnp.float32),
    }
    return p


def bert_qa_forward(params, input_ids, attention_mask, token_type_ids):
    # embeddings (gathers are plain-JAX glue)
    we = params["word_emb"][input_ids]                       # (B, S, H)
    pe = params["pos_emb"][jnp.arange(S)][None, :, :]        # (1, S, H)
    te = params["type_emb"][token_type_ids]                  # (B, S, H)
    emb = (we + pe + te).reshape(BS, H)

    # (BS, BS) additive attention bias: block-diagonal over batch + key-padding mask.
    # Cross-batch / padded keys get -1e4 -> exp underflows to exactly 0, reproducing the
    # original per-batch masked attention on the flattened (BS, H) activations.
    row_b = jnp.arange(BS) // S
    same_batch = row_b[:, None] == row_b[None, :]
    key_pad = (1.0 - attention_mask.reshape(BS).astype(jnp.float32)) * -10000.0
    bias = jnp.where(same_batch, 0.0, -10000.0) + key_pad[None, :]

    logits = bert_fused(emb, bias, params)                   # (BS, 128); cols 0..1 real
    logits = logits[:, :2].reshape(B, S, 2)
    start_logits = logits[..., 0]                            # (B, S)
    end_logits = logits[..., 1]                              # (B, S)
    # TODO(synk): training branch (len(batch)==5, CrossEntropyLoss with ignore_index) not
    # implemented; inference path (len(batch)==3, return_prob=False) is reproduced here.
    return start_logits, end_logits


if __name__ == "__main__":
    key = jax.random.PRNGKey(0)
    pkey, ikey = jax.random.split(key, 2)
    params = init_params(pkey)

    input_ids = jax.random.randint(ikey, (B, S), 0, VOCAB, dtype=jnp.int32)
    attention_mask = jnp.concatenate(
        [jnp.ones((B, S - 3), jnp.int32), jnp.zeros((B, 3), jnp.int32)], axis=1)
    token_type_ids = jnp.concatenate(
        [jnp.zeros((B, S // 2), jnp.int32), jnp.ones((B, S // 2), jnp.int32)], axis=1)

    fwd = jax.jit(bert_qa_forward)
    start_logits, end_logits = fwd(params, input_ids, attention_mask, token_type_ids)
    jax.block_until_ready((start_logits, end_logits))
    assert start_logits.shape == (B, S) and end_logits.shape == (B, S)
    assert bool(jnp.all(jnp.isfinite(start_logits))) and bool(jnp.all(jnp.isfinite(end_logits)))
    print("KERNEL_OK")
</pallas_src>

<mosaic_0001>
module attributes {stable_mosaic.version = 11 : i64} {
  func.func @bert_layer_kernel(%arg0: i32, %arg1: memref<32x64xf32, #tpu.memory_space<vmem>>, %arg2: memref<32x32xf32, #tpu.memory_space<vmem>>, %arg3: memref<1x64xf32, #tpu.memory_space<vmem>>, %arg4: memref<1x64xf32, #tpu.memory_space<vmem>>, %arg5: memref<1x64x192xbf16, #tpu.memory_space<vmem>>, %arg6: memref<1x1x192xf32, #tpu.memory_space<vmem>>, %arg7: memref<1x64x64xbf16, #tpu.memory_space<vmem>>, %arg8: memref<1x1x64xf32, #tpu.memory_space<vmem>>, %arg9: memref<1x1x64xf32, #tpu.memory_space<vmem>>, %arg10: memref<1x1x64xf32, #tpu.memory_space<vmem>>, %arg11: memref<1x64x256xbf16, #tpu.memory_space<vmem>>, %arg12: memref<1x1x256xf32, #tpu.memory_space<vmem>>, %arg13: memref<1x256x64xbf16, #tpu.memory_space<vmem>>, %arg14: memref<1x1x64xf32, #tpu.memory_space<vmem>>, %arg15: memref<1x1x64xf32, #tpu.memory_space<vmem>>, %arg16: memref<1x1x64xf32, #tpu.memory_space<vmem>>, %arg17: memref<64x128xbf16, #tpu.memory_space<vmem>>, %arg18: memref<1x128xf32, #tpu.memory_space<vmem>>, %arg19: memref<32x128xf32, #tpu.memory_space<vmem>>, %arg20: memref<32x64xbf16, #tpu.memory_space<vmem>>, %arg21: memref<4x32x32xf32, #tpu.memory_space<vmem>>) attributes {dimension_semantics = [#tpu.dimension_semantics<arbitrary>], iteration_bounds = array<i64: 2>, scalar_prefetch = 0 : i64, scratch_operands = 2 : i64, tpu.core_type = #tpu.core_type<tc>, window_params = [{pipeline_mode = #tpu.pipeline_mode<synchronous>, transform_indices = @transform_0, window_bounds = array<i64: 32, 64>}, {pipeline_mode = #tpu.pipeline_mode<synchronous>, transform_indices = @transform_1, window_bounds = array<i64: 32, 32>}, {pipeline_mode = #tpu.pipeline_mode<synchronous>, transform_indices = @transform_2, window_bounds = array<i64: 1, 64>}, {pipeline_mode = #tpu.pipeline_mode<synchronous>, transform_indices = @transform_3, window_bounds = array<i64: 1, 64>}, {transform_indices = @transform_4, window_bounds = array<i64: 1, 64, 192>}, {transform_indices = @transform_5, window_bounds = array<i64: 1, 1, 192>}, {transform_indices = @transform_6, window_bounds = array<i64: 1, 64, 64>}, {transform_indices = @transform_7, window_bounds = array<i64: 1, 1, 64>}, {transform_indices = @transform_8, window_bounds = array<i64: 1, 1, 64>}, {transform_indices = @transform_9, window_bounds = array<i64: 1, 1, 64>}, {transform_indices = @transform_10, window_bounds = array<i64: 1, 64, 256>}, {transform_indices = @transform_11, window_bounds = array<i64: 1, 1, 256>}, {transform_indices = @transform_12, window_bounds = array<i64: 1, 256, 64>}, {transform_indices = @transform_13, window_bounds = array<i64: 1, 1, 64>}, {transform_indices = @transform_14, window_bounds = array<i64: 1, 1, 64>}, {transform_indices = @transform_15, window_bounds = array<i64: 1, 1, 64>}, {pipeline_mode = #tpu.pipeline_mode<synchronous>, transform_indices = @transform_16, window_bounds = array<i64: 64, 128>}, {pipeline_mode = #tpu.pipeline_mode<synchronous>, transform_indices = @transform_17, window_bounds = array<i64: 1, 128>}, {pipeline_mode = #tpu.pipeline_mode<synchronous>, transform_indices = @transform_18, window_bounds = array<i64: 32, 128>}]} {
    %c0_i32 = arith.constant 0 : i32
    %0 = arith.cmpi eq, %arg0, %c0_i32 : i32
    %1 = arith.extui %0 : i1 to i32
    %c0_i32_0 = arith.constant 0 : i32
    %2 = arith.cmpi ne, %1, %c0_i32_0 : i32
    scf.if %2 {
      %c0_66 = arith.constant 0 : index
      %c0_67 = arith.constant 0 : index
      %163 = vector.load %arg1[%c0_66, %c0_67] : memref<32x64xf32, #tpu.memory_space<vmem>>, vector<32x64xf32>
      %c0_68 = arith.constant 0 : index
      %c0_69 = arith.constant 0 : index
      %164 = vector.load %arg3[%c0_68, %c0_69] : memref<1x64xf32, #tpu.memory_space<vmem>>, vector<1x64xf32>
      %c0_70 = arith.constant 0 : index
      %c0_71 = arith.constant 0 : index
      %165 = vector.load %arg4[%c0_70, %c0_71] : memref<1x64xf32, #tpu.memory_space<vmem>>, vector<1x64xf32>
      %cst_72 = arith.constant dense<0.000000e+00> : vector<32xf32>
      %166 = vector.multi_reduction <add>, %163, %cst_72 [1] : vector<32x64xf32> to vector<32xf32>
      %167 = vector.shape_cast %166 : vector<32xf32> to vector<32x1xf32>
      %cst_73 = arith.constant 6.400000e+01 : f32
      %168 = vector.broadcast %cst_73 : f32 to vector<32x1xf32>
      %169 = arith.divf %167, %168 : vector<32x1xf32>
      %170 = vector.broadcast %169 : vector<32x1xf32> to vector<32x64xf32>
      %171 = arith.subf %163, %170 : vector<32x64xf32>
      %172 = arith.mulf %171, %171 : vector<32x64xf32>
      %cst_74 = arith.constant dense<0.000000e+00> : vector<32xf32>
      %173 = vector.multi_reduction <add>, %172, %cst_74 [1] : vector<32x64xf32> to vector<32xf32>
      %174 = vector.shape_cast %173 : vector<32xf32> to vector<32x1xf32>
      %cst_75 = arith.constant 6.400000e+01 : f32
      %175 = vector.broadcast %cst_75 : f32 to vector<32x1xf32>
      %176 = arith.divf %174, %175 : vector<32x1xf32>
      %177 = vector.broadcast %169 : vector<32x1xf32> to vector<32x64xf32>
      %178 = arith.subf %163, %177 : vector<32x64xf32>
      %cst_76 = arith.constant 9.99999996E-13 : f32
      %179 = vector.broadcast %cst_76 : f32 to vector<32x1xf32>
      %180 = arith.addf %176, %179 : vector<32x1xf32>
      %181 = math.rsqrt %180 : vector<32x1xf32>
      %182 = vector.broadcast %181 : vector<32x1xf32> to vector<32x64xf32>
      %183 = arith.mulf %178, %182 : vector<32x64xf32>
      %184 = vector.broadcast %164 : vector<1x64xf32> to vector<32x64xf32>
      %185 = arith.mulf %183, %184 : vector<32x64xf32>
      %186 = vector.broadcast %165 : vector<1x64xf32> to vector<32x64xf32>
      %187 = arith.addf %185, %186 : vector<32x64xf32>
      %188 = arith.truncf %187 : vector<32x64xf32> to vector<32x64xbf16>
      %c0_77 = arith.constant 0 : index
      %c0_78 = arith.constant 0 : index
      %189 = vector.load %arg20[%c0_77, %c0_78] : memref<32x64xbf16, #tpu.memory_space<vmem>>, vector<32x64xbf16>
      tpu.vector_store %arg20[%c0_77, %c0_78], %188 {strides = array<i32>} : memref<32x64xbf16, #tpu.memory_space<vmem>>, vector<32x64xbf16>,
      %c0_79 = arith.constant 0 : index
      %c0_80 = arith.constant 0 : index
      %190 = vector.load %arg2[%c0_79, %c0_80] : memref<32x32xf32, #tpu.memory_space<vmem>>, vector<32x32xf32>
      %191 = vector.shape_cast %190 : vector<32x32xf32> to vector<1x32x32xf32>
      %192 = vector.shape_cast %191 : vector<1x32x32xf32> to vector<1x32x32xf32>
      %193 = vector.broadcast %192 : vector<1x32x32xf32> to vector<4x32x32xf32>
      %c0_81 = arith.constant 0 : index
      %c0_82 = arith.constant 0 : index
      %c0_83 = arith.constant 0 : index
      %194 = vector.load %arg21[%c0_81, %c0_82, %c0_83] : memref<4x32x32xf32, #tpu.memory_space<vmem>>, vector<4x32x32xf32>
      tpu.vector_store %arg21[%c0_81, %c0_82, %c0_83], %193 {strides = array<i32>} : memref<4x32x32xf32, #tpu.memory_space<vmem>>, vector<4x32x32xf32>,
    } else {
    }
    %c0 = arith.constant 0 : index
    %c0_1 = arith.constant 0 : index
    %3 = vector.load %arg20[%c0, %c0_1] : memref<32x64xbf16, #tpu.memory_space<vmem>>, vector<32x64xbf16>
    %c0_2 = arith.constant 0 : index
    %c0_3 = arith.constant 0 : index
    %c0_4 = arith.constant 0 : index
    %4 = vector.load %arg5[%c0_2, %c0_3, %c0_4] : memref<1x64x192xbf16, #tpu.memory_space<vmem>>, vector<1x64x192xbf16>
    %5 = vector.shape_cast %4 : vector<1x64x192xbf16> to vector<64x192xbf16>
    %cst = arith.constant dense<0.000000e+00> : vector<32x192xf32>
    %6 = tpu.matmul %3, %5, %cst {dimension_numbers = #tpu.dot_dimension_numbers<[1], [0], [0], [1], [0, 0, 1, 1], [], []>} : vector<32x64xbf16>, vector<64x192xbf16>, vector<32x192xf32> -> vector<32x192xf32>
    %c0_5 = arith.constant 0 : index
    %c0_6 = arith.constant 0 : index
    %c0_7 = arith.constant 0 : index
    %7 = vector.load %arg6[%c0_5, %c0_6, %c0_7] : memref<1x1x192xf32, #tpu.memory_space<vmem>>, vector<1x1x192xf32>
    %8 = vector.shape_cast %7 : vector<1x1x192xf32> to vector<1x192xf32>
    %9 = vector.broadcast %8 : vector<1x192xf32> to vector<32x192xf32>
    %10 = arith.addf %6, %9 : vector<32x192xf32>
    %11 = vector.extract_strided_slice %10 {offsets = [0, 0], sizes = [32, 16], strides = [1, 1]} : vector<32x192xf32> to vector<32x16xf32>
    %12 = vector.extract_strided_slice %10 {offsets = [0, 16], sizes = [32, 16], strides = [1, 1]} : vector<32x192xf32> to vector<32x16xf32>
    %13 = vector.extract_strided_slice %10 {offsets = [0, 32], sizes = [32, 16], strides = [1, 1]} : vector<32x192xf32> to vector<32x16xf32>
    %14 = vector.extract_strided_slice %10 {offsets = [0, 48], sizes = [32, 16], strides = [1, 1]} : vector<32x192xf32> to vector<32x16xf32>
    %15 = vector.extract_strided_slice %10 {offsets = [0, 64], sizes = [32, 16], strides = [1, 1]} : vector<32x192xf32> to vector<32x16xf32>
    %16 = vector.extract_strided_slice %10 {offsets = [0, 80], sizes = [32, 16], strides = [1, 1]} : vector<32x192xf32> to vector<32x16xf32>
    %17 = vector.extract_strided_slice %10 {offsets = [0, 96], sizes = [32, 16], strides = [1, 1]} : vector<32x192xf32> to vector<32x16xf32>
    %18 = vector.extract_strided_slice %10 {offsets = [0, 112], sizes = [32, 16], strides = [1, 1]} : vector<32x192xf32> to vector<32x16xf32>
    %19 = vector.extract_strided_slice %10 {offsets = [0, 128], sizes = [32, 16], strides = [1, 1]} : vector<32x192xf32> to vector<32x16xf32>
    %20 = vector.extract_strided_slice %10 {offsets = [0, 144], sizes = [32, 16], strides = [1, 1]} : vector<32x192xf32> to vector<32x16xf32>
    %21 = vector.extract_strided_slice %10 {offsets = [0, 160], sizes = [32, 16], strides = [1, 1]} : vector<32x192xf32> to vector<32x16xf32>
    %22 = vector.extract_strided_slice %10 {offsets = [0, 176], sizes = [32, 16], strides = [1, 1]} : vector<32x192xf32> to vector<32x16xf32>
    %23 = vector.shape_cast %11 : vector<32x16xf32> to vector<1x32x16xf32>
    %24 = vector.shape_cast %12 : vector<32x16xf32> to vector<1x32x16xf32>
    %25 = vector.shape_cast %13 : vector<32x16xf32> to vector<1x32x16xf32>
    %26 = vector.shape_cast %14 : vector<32x16xf32> to vector<1x32x16xf32>
    %27 = vector.shape_cast %15 : vector<32x16xf32> to vector<1x32x16xf32>
    %28 = vector.shape_cast %16 : vector<32x16xf32> to vector<1x32x16xf32>
    %29 = vector.shape_cast %17 : vector<32x16xf32> to vector<1x32x16xf32>
    %30 = vector.shape_cast %18 : vector<32x16xf32> to vector<1x32x16xf32>
    %31 = vector.shape_cast %19 : vector<32x16xf32> to vector<1x32x16xf32>
    %32 = vector.shape_cast %20 : vector<32x16xf32> to vector<1x32x16xf32>
    %33 = vector.shape_cast %21 : vector<32x16xf32> to vector<1x32x16xf32>
    %34 = vector.shape_cast %22 : vector<32x16xf32> to vector<1x32x16xf32>
    %35 = tpu.concatenate %23, %24, %25, %26, %27, %28, %29, %30, %31, %32, %33, %34 in 0 : vector<1x32x16xf32>, vector<1x32x16xf32>, vector<1x32x16xf32>, vector<1x32x16xf32>, vector<1x32x16xf32>, vector<1x32x16xf32>, vector<1x32x16xf32>, vector<1x32x16xf32>, vector<1x32x16xf32>, vector<1x32x16xf32>, vector<1x32x16xf32>, vector<1x32x16xf32> -> vector<12x32x16xf32>
    %36 = vector.extract_strided_slice %35 {offsets = [0, 0, 0], sizes = [4, 32, 16], strides = [1, 1, 1]} : vector<12x32x16xf32> to vector<4x32x16xf32>
    %cst_8 = arith.constant 2.500000e-01 : f32
    %37 = vector.broadcast %cst_8 : f32 to vector<4x32x16xf32>
    %38 = arith.mulf %36, %37 : vector<4x32x16xf32>
    %39 = arith.truncf %38 : vector<4x32x16xf32> to vector<4x32x16xbf16>
    %40 = vector.extract_strided_slice %35 {offsets = [4, 0, 0], sizes = [4, 32, 16], strides = [1, 1, 1]} : vector<12x32x16xf32> to vector<4x32x16xf32>
    %41 = arith.truncf %40 : vector<4x32x16xf32> to vector<4x32x16xbf16>
    %42 = vector.extract_strided_slice %35 {offsets = [8, 0, 0], sizes = [4, 32, 16], strides = [1, 1, 1]} : vector<12x32x16xf32> to vector<4x32x16xf32>
    %43 = arith.truncf %42 : vector<4x32x16xf32> to vector<4x32x16xbf16>
    "tpu.trace_start"() <{level = 10 : i32, message = "hqd,hkd->hqk"}> : () -> ()
    %cst_9 = arith.constant dense<0.000000e+00> : vector<4x32x32xf32>
    %44 = tpu.matmul %39, %41, %cst_9 {dimension_numbers = #tpu.dot_dimension_numbers<[2], [2], [1], [1], [0, 0, 0, 1, 1, 1], [0], [0]>} : vector<4x32x16xbf16>, vector<4x32x16xbf16>, vector<4x32x32xf32> -> vector<4x32x32xf32>
    "tpu.trace_stop"() : () -> ()
    %c0_10 = arith.constant 0 : index
    %c0_11 = arith.constant 0 : index
    %c0_12 = arith.constant 0 : index
    %45 = vector.load %arg21[%c0_10, %c0_11, %c0_12] : memref<4x32x32xf32, #tpu.memory_space<vmem>>, vector<4x32x32xf32>
    %46 = arith.addf %44, %45 : vector<4x32x32xf32>
    %47 = math.exp %46 : vector<4x32x32xf32>
    %cst_13 = arith.constant dense<0.000000e+00> : vector<4x32xf32>
    %48 = vector.multi_reduction <add>, %47, %cst_13 [2] : vector<4x32x32xf32> to vector<4x32xf32>
    %49 = vector.shape_cast %48 : vector<4x32xf32> to vector<4x32x1xf32>
    %cst_14 = arith.constant 1.000000e-30 : f32
    %50 = vector.broadcast %cst_14 : f32 to vector<4x32x1xf32>
    %51 = arith.maximumf %49, %50 : vector<4x32x1xf32>
    %52 = tpu.reciprocal %51 {approx = true} : vector<4x32x1xf32> -> vector<4x32x1xf32>
    %53 = vector.broadcast %52 : vector<4x32x1xf32> to vector<4x32x32xf32>
    %54 = arith.mulf %47, %53 : vector<4x32x32xf32>
    %55 = arith.truncf %54 : vector<4x32x32xf32> to vector<4x32x32xbf16>
    "tpu.trace_start"() <{level = 10 : i32, message = "hqk,hkd->hqd"}> : () -> ()
    %cst_15 = arith.constant dense<0.000000e+00> : vector<4x32x16xf32>
    %56 = tpu.matmul %55, %43, %cst_15 {dimension_numbers = #tpu.dot_dimension_numbers<[2], [1], [1], [2], [0, 0, 0, 1, 1, 2], [0], [0]>} : vector<4x32x32xbf16>, vector<4x32x16xbf16>, vector<4x32x16xf32> -> vector<4x32x16xf32>
    "tpu.trace_stop"() : () -> ()
    %57 = vector.extract_strided_slice %56 {offsets = [0, 0, 0], sizes = [1, 32, 16], strides = [1, 1, 1]} : vector<4x32x16xf32> to vector<1x32x16xf32>
    %58 = vector.shape_cast %57 : vector<1x32x16xf32> to vector<32x16xf32>
    %59 = vector.extract_strided_slice %56 {offsets = [1, 0, 0], sizes = [1, 32, 16], strides = [1, 1, 1]} : vector<4x32x16xf32> to vector<1x32x16xf32>
    %60 = vector.shape_cast %59 : vector<1x32x16xf32> to vector<32x16xf32>
    %61 = vector.extract_strided_slice %56 {offsets = [2, 0, 0], sizes = [1, 32, 16], strides = [1, 1, 1]} : vector<4x32x16xf32> to vector<1x32x16xf32>
    %62 = vector.shape_cast %61 : vector<1x32x16xf32> to vector<32x16xf32>
    %63 = vector.extract_strided_slice %56 {offsets = [3, 0, 0], sizes = [1, 32, 16], strides = [1, 1, 1]} : vector<4x32x16xf32> to vector<1x32x16xf32>
    %64 = vector.shape_cast %63 : vector<1x32x16xf32> to vector<32x16xf32>
    %65 = tpu.concatenate %58, %60, %62, %64 in 1 : vector<32x16xf32>, vector<32x16xf32>, vector<32x16xf32>, vector<32x16xf32> -> vector<32x64xf32>
    %66 = arith.truncf %65 : vector<32x64xf32> to vector<32x64xbf16>
    %c0_16 = arith.constant 0 : index
    %c0_17 = arith.constant 0 : index
    %c0_18 = arith.constant 0 : index
    %67 = vector.load %arg7[%c0_16, %c0_17, %c0_18] : memref<1x64x64xbf16, #tpu.memory_space<vmem>>, vector<1x64x64xbf16>
    %68 = vector.shape_cast %67 : vector<1x64x64xbf16> to vector<64x64xbf16>
    %cst_19 = arith.constant dense<0.000000e+00> : vector<32x64xf32>
    %69 = tpu.matmul %66, %68, %cst_19 {dimension_numbers = #tpu.dot_dimension_numbers<[1], [0], [0], [1], [0, 0, 1, 1], [], []>} : vector<32x64xbf16>, vector<64x64xbf16>, vector<32x64xf32> -> vector<32x64xf32>
    %c0_20 = arith.constant 0 : index
    %c0_21 = arith.constant 0 : index
    %c0_22 = arith.constant 0 : index
    %70 = vector.load %arg8[%c0_20, %c0_21, %c0_22] : memref<1x1x64xf32, #tpu.memory_space<vmem>>, vector<1x1x64xf32>
    %71 = vector.shape_cast %70 : vector<1x1x64xf32> to vector<1x64xf32>
    %72 = vector.broadcast %71 : vector<1x64xf32> to vector<32x64xf32>
    %73 = arith.addf %69, %72 : vector<32x64xf32>
    %74 = arith.extf %3 : vector<32x64xbf16> to vector<32x64xf32>
    %75 = arith.addf %74, %73 : vector<32x64xf32>
    %c0_23 = arith.constant 0 : index
    %c0_24 = arith.constant 0 : index
    %c0_25 = arith.constant 0 : index
    %76 = vector.load %arg9[%c0_23, %c0_24, %c0_25] : memref<1x1x64xf32, #tpu.memory_space<vmem>>, vector<1x1x64xf32>
    %77 = vector.shape_cast %76 : vector<1x1x64xf32> to vector<1x64xf32>
    %c0_26 = arith.constant 0 : index
    %c0_27 = arith.constant 0 : index
    %c0_28 = arith.constant 0 : index
    %78 = vector.load %arg10[%c0_26, %c0_27, %c0_28] : memref<1x1x64xf32, #tpu.memory_space<vmem>>, vector<1x1x64xf32>
    %79 = vector.shape_cast %78 : vector<1x1x64xf32> to vector<1x64xf32>
    %cst_29 = arith.constant dense<0.000000e+00> : vector<32xf32>
    %80 = vector.multi_reduction <add>, %75, %cst_29 [1] : vector<32x64xf32> to vector<32xf32>
    %81 = vector.shape_cast %80 : vector<32xf32> to vector<32x1xf32>
    %cst_30 = arith.constant 6.400000e+01 : f32
    %82 = vector.broadcast %cst_30 : f32 to vector<32x1xf32>
    %83 = arith.divf %81, %82 : vector<32x1xf32>
    %84 = vector.broadcast %83 : vector<32x1xf32> to vector<32x64xf32>
    %85 = arith.subf %75, %84 : vector<32x64xf32>
    %86 = arith.mulf %85, %85 : vector<32x64xf32>
    %cst_31 = arith.constant dense<0.000000e+00> : vector<32xf32>
    %87 = vector.multi_reduction <add>, %86, %cst_31 [1] : vector<32x64xf32> to vector<32xf32>
    %88 = vector.shape_cast %87 : vector<32xf32> to vector<32x1xf32>
    %cst_32 = arith.constant 6.400000e+01 : f32
    %89 = vector.broadcast %cst_32 : f32 to vector<32x1xf32>
    %90 = arith.divf %88, %89 : vector<32x1xf32>
    %91 = vector.broadcast %83 : vector<32x1xf32> to vector<32x64xf32>
    %92 = arith.subf %75, %91 : vector<32x64xf32>
    %cst_33 = arith.constant 9.99999996E-13 : f32
    %93 = vector.broadcast %cst_33 : f32 to vector<32x1xf32>
    %94 = arith.addf %90, %93 : vector<32x1xf32>
    %95 = math.rsqrt %94 : vector<32x1xf32>
    %96 = vector.broadcast %95 : vector<32x1xf32> to vector<32x64xf32>
    %97 = arith.mulf %92, %96 : vector<32x64xf32>
    %98 = vector.broadcast %77 : vector<1x64xf32> to vector<32x64xf32>
    %99 = arith.mulf %97, %98 : vector<32x64xf32>
    %100 = vector.broadcast %79 : vector<1x64xf32> to vector<32x64xf32>
    %101 = arith.addf %99, %100 : vector<32x64xf32>
    %102 = arith.truncf %101 : vector<32x64xf32> to vector<32x64xbf16>
    %c0_34 = arith.constant 0 : index
    %c0_35 = arith.constant 0 : index
    %c0_36 = arith.constant 0 : index
    %103 = vector.load %arg11[%c0_34, %c0_35, %c0_36] : memref<1x64x256xbf16, #tpu.memory_space<vmem>>, vector<1x64x256xbf16>
    %104 = vector.shape_cast %103 : vector<1x64x256xbf16> to vector<64x256xbf16>
    %cst_37 = arith.constant dense<0.000000e+00> : vector<32x256xf32>
    %105 = tpu.matmul %102, %104, %cst_37 {dimension_numbers = #tpu.dot_dimension_numbers<[1], [0], [0], [1], [0, 0, 1, 1], [], []>} : vector<32x64xbf16>, vector<64x256xbf16>, vector<32x256xf32> -> vector<32x256xf32>
    %c0_38 = arith.constant 0 : index
    %c0_39 = arith.constant 0 : index
    %c0_40 = arith.constant 0 : index
    %106 = vector.load %arg12[%c0_38, %c0_39, %c0_40] : memref<1x1x256xf32, #tpu.memory_space<vmem>>, vector<1x1x256xf32>
    %107 = vector.shape_cast %106 : vector<1x1x256xf32> to vector<1x256xf32>
    %108 = vector.broadcast %107 : vector<1x256xf32> to vector<32x256xf32>
    %109 = arith.addf %105, %108 : vector<32x256xf32>
    %cst_41 = arith.constant 5.000000e-01 : f32
    %110 = vector.broadcast %cst_41 : f32 to vector<32x256xf32>
    %111 = arith.mulf %110, %109 : vector<32x256xf32>
    %cst_42 = arith.constant 4.471500e-02 : f32
    %112 = vector.broadcast %cst_42 : f32 to vector<32x256xf32>
    %113 = arith.mulf %112, %109 : vector<32x256xf32>
    %114 = arith.mulf %113, %109 : vector<32x256xf32>
    %115 = arith.mulf %114, %109 : vector<32x256xf32>
    %116 = arith.addf %109, %115 : vector<32x256xf32>
    %cst_43 = arith.constant 0.797884583 : f32
    %117 = vector.broadcast %cst_43 : f32 to vector<32x256xf32>
    %118 = arith.mulf %117, %116 : vector<32x256xf32>
    %119 = math.tanh %118 : vector<32x256xf32>
    %cst_44 = arith.constant 1.000000e+00 : f32
    %120 = vector.broadcast %cst_44 : f32 to vector<32x256xf32>
    %121 = arith.addf %120, %119 : vector<32x256xf32>
    %122 = arith.mulf %111, %121 : vector<32x256xf32>
    %123 = arith.truncf %122 : vector<32x256xf32> to vector<32x256xbf16>
    %c0_45 = arith.constant 0 : index
    %c0_46 = arith.constant 0 : index
    %c0_47 = arith.constant 0 : index
    %124 = vector.load %arg13[%c0_45, %c0_46, %c0_47] : memref<1x256x64xbf16, #tpu.memory_space<vmem>>, vector<1x256x64xbf16>
    %125 = vector.shape_cast %124 : vector<1x256x64xbf16> to vector<256x64xbf16>
    %cst_48 = arith.constant dense<0.000000e+00> : vector<32x64xf32>
    %126 = tpu.matmul %123, %125, %cst_48 {dimension_numbers = #tpu.dot_dimension_numbers<[1], [0], [0], [1], [0, 0, 1, 1], [], []>} : vector<32x256xbf16>, vector<256x64xbf16>, vector<32x64xf32> -> vector<32x64xf32>
    %c0_49 = arith.constant 0 : index
    %c0_50 = arith.constant 0 : index
    %c0_51 = arith.constant 0 : index
    %127 = vector.load %arg14[%c0_49, %c0_50, %c0_51] : memref<1x1x64xf32, #tpu.memory_space<vmem>>, vector<1x1x64xf32>
    %128 = vector.shape_cast %127 : vector<1x1x64xf32> to vector<1x64xf32>
    %129 = vector.broadcast %128 : vector<1x64xf32> to vector<32x64xf32>
    %130 = arith.addf %126, %129 : vector<32x64xf32>
    %131 = arith.addf %101, %130 : vector<32x64xf32>
    %c0_52 = arith.constant 0 : index
    %c0_53 = arith.constant 0 : index
    %c0_54 = arith.constant 0 : index
    %132 = vector.load %arg15[%c0_52, %c0_53, %c0_54] : memref<1x1x64xf32, #tpu.memory_space<vmem>>, vector<1x1x64xf32>
    %133 = vector.shape_cast %132 : vector<1x1x64xf32> to vector<1x64xf32>
    %c0_55 = arith.constant 0 : index
    %c0_56 = arith.constant 0 : index
    %c0_57 = arith.constant 0 : index
    %134 = vector.load %arg16[%c0_55, %c0_56, %c0_57] : memref<1x1x64xf32, #tpu.memory_space<vmem>>, vector<1x1x64xf32>
    %135 = vector.shape_cast %134 : vector<1x1x64xf32> to vector<1x64xf32>
    %cst_58 = arith.constant dense<0.000000e+00> : vector<32xf32>
    %136 = vector.multi_reduction <add>, %131, %cst_58 [1] : vector<32x64xf32> to vector<32xf32>
    %137 = vector.shape_cast %136 : vector<32xf32> to vector<32x1xf32>
    %cst_59 = arith.constant 6.400000e+01 : f32
    %138 = vector.broadcast %cst_59 : f32 to vector<32x1xf32>
    %139 = arith.divf %137, %138 : vector<32x1xf32>
    %140 = vector.broadcast %139 : vector<32x1xf32> to vector<32x64xf32>
    %141 = arith.subf %131, %140 : vector<32x64xf32>
    %142 = arith.mulf %141, %141 : vector<32x64xf32>
    %cst_60 = arith.constant dense<0.000000e+00> : vector<32xf32>
    %143 = vector.multi_reduction <add>, %142, %cst_60 [1] : vector<32x64xf32> to vector<32xf32>
    %144 = vector.shape_cast %143 : vector<32xf32> to vector<32x1xf32>
    %cst_61 = arith.constant 6.400000e+01 : f32
    %145 = vector.broadcast %cst_61 : f32 to vector<32x1xf32>
    %146 = arith.divf %144, %145 : vector<32x1xf32>
    %147 = vector.broadcast %139 : vector<32x1xf32> to vector<32x64xf32>
    %148 = arith.subf %131, %147 : vector<32x64xf32>
    %cst_62 = arith.constant 9.99999996E-13 : f32
    %149 = vector.broadcast %cst_62 : f32 to vector<32x1xf32>
    %150 = arith.addf %146, %149 : vector<32x1xf32>
    %151 = math.rsqrt %150 : vector<32x1xf32>
    %152 = vector.broadcast %151 : vector<32x1xf32> to vector<32x64xf32>
    %153 = arith.mulf %148, %152 : vector<32x64xf32>
    %154 = vector.broadcast %133 : vector<1x64xf32> to vector<32x64xf32>
    %155 = arith.mulf %153, %154 : vector<32x64xf32>
    %156 = vector.broadcast %135 : vector<1x64xf32> to vector<32x64xf32>
    %157 = arith.addf %155, %156 : vector<32x64xf32>
    %158 = arith.truncf %157 : vector<32x64xf32> to vector<32x64xbf16>
    %c0_63 = arith.constant 0 : index
    %c0_64 = arith.constant 0 : index
    %159 = vector.load %arg20[%c0_63, %c0_64] : memref<32x64xbf16, #tpu.memory_space<vmem>>, vector<32x64xbf16>
    tpu.vector_store %arg20[%c0_63, %c0_64], %158 {strides = array<i32>} : memref<32x64xbf16, #tpu.memory_space<vmem>>, vector<32x64xbf16>,
    %c1_i32 = arith.constant 1 : i32
    %160 = arith.cmpi eq, %arg0, %c1_i32 : i32
    %161 = arith.extui %160 : i1 to i32
    %c0_i32_65 = arith.constant 0 : i32
    %162 = arith.cmpi ne, %161, %c0_i32_65 : i32
    scf.if %162 {
      %c0_66 = arith.constant 0 : index
      %c0_67 = arith.constant 0 : index
      %163 = vector.load %arg17[%c0_66, %c0_67] : memref<64x128xbf16, #tpu.memory_space<vmem>>, vector<64x128xbf16>
      %cst_68 = arith.constant dense<0.000000e+00> : vector<32x128xf32>
      %164 = tpu.matmul %158, %163, %cst_68 {dimension_numbers = #tpu.dot_dimension_numbers<[1], [0], [0], [1], [0, 0, 1, 1], [], []>} : vector<32x64xbf16>, vector<64x128xbf16>, vector<32x128xf32> -> vector<32x128xf32>
      %c0_69 = arith.constant 0 : index
      %c0_70 = arith.constant 0 : index
      %165 = vector.load %arg18[%c0_69, %c0_70] : memref<1x128xf32, #tpu.memory_space<vmem>>, vector<1x128xf32>
      %166 = vector.broadcast %165 : vector<1x128xf32> to vector<32x128xf32>
      %167 = arith.addf %164, %166 : vector<32x128xf32>
      %c0_71 = arith.constant 0 : index
      %c0_72 = arith.constant 0 : index
      %168 = vector.load %arg19[%c0_71, %c0_72] : memref<32x128xf32, #tpu.memory_space<vmem>>, vector<32x128xf32>
      tpu.vector_store %arg19[%c0_71, %c0_72], %167 {strides = array<i32>} : memref<32x128xf32, #tpu.memory_space<vmem>>, vector<32x128xf32>,
    } else {
    }
    return
  }
  func.func @transform_0(%arg0: i32) -> (i32, i32) {
    %c0_i32 = arith.constant 0 : i32
    %c0_i32_0 = arith.constant 0 : i32
    %c0_i32_1 = arith.constant 0 : i32
    return %c0_i32, %c0_i32_0 : i32, i32
  }
  func.func @transform_1(%arg0: i32) -> (i32, i32) {
    %c0_i32 = arith.constant 0 : i32
    %c0_i32_0 = arith.constant 0 : i32
    %c0_i32_1 = arith.constant 0 : i32
    return %c0_i32, %c0_i32_0 : i32, i32
  }
  func.func @transform_2(%arg0: i32) -> (i32, i32) {
    %c0_i32 = arith.constant 0 : i32
    %c0_i32_0 = arith.constant 0 : i32
    %c0_i32_1 = arith.constant 0 : i32
    return %c0_i32, %c0_i32_0 : i32, i32
  }
  func.func @transform_3(%arg0: i32) -> (i32, i32) {
    %c0_i32 = arith.constant 0 : i32
    %c0_i32_0 = arith.constant 0 : i32
    %c0_i32_1 = arith.constant 0 : i32
    return %c0_i32, %c0_i32_0 : i32, i32
  }
  func.func @transform_4(%arg0: i32) -> (i32, i32, i32) {
    %c0_i32 = arith.constant 0 : i32
    %c0_i32_0 = arith.constant 0 : i32
    %c0_i32_1 = arith.constant 0 : i32
    return %arg0, %c0_i32, %c0_i32_0 : i32, i32, i32
  }
  func.func @transform_5(%arg0: i32) -> (i32, i32, i32) {
    %c0_i32 = arith.constant 0 : i32
    %c0_i32_0 = arith.constant 0 : i32
    %c0_i32_1 = arith.constant 0 : i32
    return %arg0, %c0_i32, %c0_i32_0 : i32, i32, i32
  }
  func.func @transform_6(%arg0: i32) -> (i32, i32, i32) {
    %c0_i32 = arith.constant 0 : i32
    %c0_i32_0 = arith.constant 0 : i32
    %c0_i32_1 = arith.constant 0 : i32
    return %arg0, %c0_i32, %c0_i32_0 : i32, i32, i32
  }
  func.func @transform_7(%arg0: i32) -> (i32, i32, i32) {
    %c0_i32 = arith.constant 0 : i32
    %c0_i32_0 = arith.constant 0 : i32
    %c0_i32_1 = arith.constant 0 : i32
    return %arg0, %c0_i32, %c0_i32_0 : i32, i32, i32
  }
  func.func @transform_8(%arg0: i32) -> (i32, i32, i32) {
    %c0_i32 = arith.constant 0 : i32
    %c0_i32_0 = arith.constant 0 : i32
    %c0_i32_1 = arith.constant 0 : i32
    return %arg0, %c0_i32, %c0_i32_0 : i32, i32, i32
  }
  func.func @transform_9(%arg0: i32) -> (i32, i32, i32) {
    %c0_i32 = arith.constant 0 : i32
    %c0_i32_0 = arith.constant 0 : i32
    %c0_i32_1 = arith.constant 0 : i32
    return %arg0, %c0_i32, %c0_i32_0 : i32, i32, i32
  }
  func.func @transform_10(%arg0: i32) -> (i32, i32, i32) {
    %c0_i32 = arith.constant 0 : i32
    %c0_i32_0 = arith.constant 0 : i32
    %c0_i32_1 = arith.constant 0 : i32
    return %arg0, %c0_i32, %c0_i32_0 : i32, i32, i32
  }
  func.func @transform_11(%arg0: i32) -> (i32, i32, i32) {
    %c0_i32 = arith.constant 0 : i32
    %c0_i32_0 = arith.constant 0 : i32
    %c0_i32_1 = arith.constant 0 : i32
    return %arg0, %c0_i32, %c0_i32_0 : i32, i32, i32
  }
  func.func @transform_12(%arg0: i32) -> (i32, i32, i32) {
    %c0_i32 = arith.constant 0 : i32
    %c0_i32_0 = arith.constant 0 : i32
    %c0_i32_1 = arith.constant 0 : i32
    return %arg0, %c0_i32, %c0_i32_0 : i32, i32, i32
  }
  func.func @transform_13(%arg0: i32) -> (i32, i32, i32) {
    %c0_i32 = arith.constant 0 : i32
    %c0_i32_0 = arith.constant 0 : i32
    %c0_i32_1 = arith.constant 0 : i32
    return %arg0, %c0_i32, %c0_i32_0 : i32, i32, i32
  }
  func.func @transform_14(%arg0: i32) -> (i32, i32, i32) {
    %c0_i32 = arith.constant 0 : i32
    %c0_i32_0 = arith.constant 0 : i32
    %c0_i32_1 = arith.constant 0 : i32
    return %arg0, %c0_i32, %c0_i32_0 : i32, i32, i32
  }
  func.func @transform_15(%arg0: i32) -> (i32, i32, i32) {
    %c0_i32 = arith.constant 0 : i32
    %c0_i32_0 = arith.constant 0 : i32
    %c0_i32_1 = arith.constant 0 : i32
    return %arg0, %c0_i32, %c0_i32_0 : i32, i32, i32
  }
  func.func @transform_16(%arg0: i32) -> (i32, i32) {
    %c0_i32 = arith.constant 0 : i32
    %c0_i32_0 = arith.constant 0 : i32
    %c0_i32_1 = arith.constant 0 : i32
    return %c0_i32, %c0_i32_0 : i32, i32
  }
  func.func @transform_17(%arg0: i32) -> (i32, i32) {
    %c0_i32 = arith.constant 0 : i32
    %c0_i32_0 = arith.constant 0 : i32
    %c0_i32_1 = arith.constant 0 : i32
    return %c0_i32, %c0_i32_0 : i32, i32
  }
  func.func @transform_18(%arg0: i32) -> (i32, i32) {
    %c0_i32 = arith.constant 0 : i32
    %c0_i32_0 = arith.constant 0 : i32
    %c0_i32_1 = arith.constant 0 : i32
    return %c0_i32, %c0_i32_0 : i32, i32
  }
}

</mosaic_0001>

<bundles_post_ra>
// kernel: bert_qa_forward.1
= control target key start
LH: loop header
LB: loop body
LE: loop exit
PB: predicated region body
PF: predicated region fallthrough
CT: control target
= control target key end

     0   :  { %s3348_s27 = smov 0   ;;  %s3865_s0 = inlined_call_operand.vmem [shape: f32[32,64], index: 0, kind: input, shape index: {}]   ;;  %s3866_s1 = inlined_call_operand.vmem [shape: f32[32,32], index: 1, kind: input, shape index: {}]   ;;  %s3867_s2 = inlined_call_operand.vmem [shape: f32[1,64], index: 2, kind: input, shape index: {}]   ;;  %s3868_s3 = inlined_call_operand.vmem [shape: f32[1,64], index: 3, kind: input, shape index: {}]   ;;  %s3869_s4 = inlined_call_operand.vmem [shape: bf16[2,64,192], index: 4, kind: input, shape index: {}]   ;;  %s3870_s5 = inlined_call_operand.vmem [shape: f32[2,1,192], index: 5, kind: input, shape index: {}]   ;;  %s3871_s6 = inlined_call_operand.vmem [shape: bf16[2,64,64], index: 6, kind: input, shape index: {}]   ;;  %s3872_s7 = inlined_call_operand.vmem [shape: f32[2,1,64], index: 7, kind: input, shape index: {}]   ;;  %s3873_s8 = inlined_call_operand.vmem [shape: f32[2,1,64], index: 8, kind: input, shape index: {}]   ;;  %s3874_s9 = inlined_call_operand.vmem [shape: f32[2,1,64], index: 9, kind: input, shape index: {}]   ;;  %s3875_s10 = inlined_call_operand.vmem [shape: bf16[2,64,256], index: 10, kind: input, shape index: {}]   ;;  %s3876_s11 = inlined_call_operand.vmem [shape: f32[2,1,256], index: 11, kind: input, shape index: {}]   ;;  %s3877_s12 = inlined_call_operand.vmem [shape: bf16[2,256,64], index: 12, kind: input, shape index: {}]   ;;  %s3878_s13 = inlined_call_operand.vmem [shape: f32[2,1,64], index: 13, kind: input, shape index: {}]   ;;  %s3879_s14 = inlined_call_operand.vmem [shape: f32[2,1,64], index: 14, kind: input, shape index: {}]   ;;  %s3880_s15 = inlined_call_operand.vmem [shape: f32[2,1,64], index: 15, kind: input, shape index: {}]   ;;  %s3881_s16 = inlined_call_operand.vmem [shape: bf16[64,128], index: 16, kind: input, shape index: {}]   ;;  %s3882_s17 = inlined_call_operand.vmem [shape: f32[1,128], index: 17, kind: input, shape index: {}]   ;;  %s3883_s18 = inlined_call_operand.vmem [shape: f32[32,128], index: 18, kind: output, shape index: {}]  }
   0x1   :  { %3889 = sst [smem:[#allocation6_spill]] %s3865_s0 }
   0x2   :  { %3890 = sst [smem:[#allocation7_spill]] %s3866_s1 }
   0x3   :  { %3891 = sst [smem:[#allocation8_spill]] %s3867_s2 }
   0x4   :  { %3892 = sst [smem:[#allocation9_spill]] %s3868_s3 }
   0x5   :  { %3893 = sst [smem:[#allocation10_spill]] %s3869_s4 }
   0x6   :  { %3894 = sst [smem:[#allocation11_spill]] %s3870_s5 }
   0x7   :  { %3895 = sst [smem:[#allocation12_spill]] %s3871_s6 }
   0x8   :  { %3896 = sst [smem:[#allocation13_spill]] %s3881_s16 }
   0x9   :  { %3897 = sst [smem:[#allocation14_spill]] %s3882_s17 }
   0xa   :  { %3898 = sst [smem:[#allocation15_spill]] %s3883_s18 }
   0xb LB: > { %3899 = sst [smem:[#allocation4_spill]] %s3243_s27  ;;  %s3354_s28 = sadd.s32 4294967295, %s3243_s27   ;;  %s3243_s27 = sphi %s3348_s27, %s28_s27  }
   0xc   : > { %p2707_p0 = scmp.ge.s32.totalorder %s3243_s27, 1  ;;  %p603_p1 = scmp.lt.s32.totalorder %s3243_s27, 3 }
   0xe   : > { %p604_p2 = pnand %p2707_p0, %p603_p1 }
  0x10   : > { %607 = sbr.rel (%p604_p2) target bundleno = 3037 (0xbdd), region = 92 }
  0x17   : > { %p693_p3 = scmp.lt.s32.totalorder %s3354_s28, 1  ;;  %s3900_s4 = sld [smem:[#allocation10_spill]] }
  0x18   : > { %s3901_s5 = sld [smem:[#allocation11_spill]]  ;;  %s3903_s6 = sld [smem:[#allocation12_spill]] }
  0x19   : > { %s3360_s29 = scalar_select %p693_p3, %s3354_s28, 1 }
  0x1a   : > { %p2718_p4 = scmp.ne.s32.totalorder %s3354_s28, 0 }
  0x1b   : > { %s2795_s30 = sshll.u32 %s3360_s29, 6  ;;  %s2710_s0 = sshll.u32 %s3360_s29, 1  ;;  %vm750_vm0 = vcmask (!%p2718_p4), 523264   ;;  %vm832_vm1 = vcmask (!%p2718_p4), 261120  }
  0x1c   : > { %s2796_s23 = sshll.u32 %s3360_s29, 5  ;;  %s3400_s26 = scalar_lea.vmem %s3876_s11, %s2710_s0 }
  0x1d   : > { %s3367_s20 = scalar_lea.vmem %s3900_s4, %s2795_s30  ;;  %s2798_s18 = sshll.u32 %s3360_s29, 7 }
  0x1e   : > { %s3372_s2 = scalar_lea.vmem %s3901_s5, %s2710_s0  ;;  %s3382_s17 = scalar_lea.vmem %s3903_s6, %s2796_s23 }
  0x1f   : > { %3902 = sst [smem:[#allocation5_spill]] %s3372_s2  ;;  %s3395_s2 = scalar_lea.vmem %s3875_s10, %s2795_s30 }
  0x20   : > { %s3406_s3 = scalar_lea.vmem %s3877_s12, %s2798_s18  ;;  %s732_s4 = scalar_lea.vmem %s3878_s13, %s3360_s29 }
  0x21   : > { %s735_s5 = scalar_lea.vmem %s3879_s14, %s3360_s29  ;;  %s738_s24 = scalar_lea.vmem %s3880_s15, %s3360_s29 }
  0x22   : > { %743 = sbr.rel (%p2718_p4) target bundleno = 365 (0x16d), region = 96  ;;  %s3904_s27 = sld [smem:[#allocation6_spill]] (!%p2718_p4) }
  0x23   : > { %s3906_s22 = sld [smem:[#allocation7_spill]] (!%p2718_p4)  ;;  %s3907_s6 = sld [smem:[#allocation8_spill]] (!%p2718_p4) }
  0x24   : > { %s3908_s25 = sld [smem:[#allocation9_spill]] (!%p2718_p4) }
  0x28   : > { %s3905_s23 = smov (!%p2718_p4), %s3904_s27  ;;  %v744_v0 = vld [vmem:[%s3904_s27] sm:$0xff] (!%p2718_p4) }
  0x29   : > { %v746_v1 = vld [vmem:[%s3905_s23 + $0x10] sm:$0xff]  ;;  %v745_v2 = vld [vmem:[%s3905_s23 + $0x8] sm:$0xff]  ;;  %v751_v3 = vsel %vm750_vm0, %v744_v0, 0.0  ;;  %v747_v5 = vld [vmem:[%s3905_s23 + $0x18] sm:$0xff] }
  0x2a   : > { %v757_v4 = vsel %vm750_vm0, %v746_v1, 0.0  ;;  %752 = vadd.xlane.f32.xlu0 %v751_v3  ;;  %v754_v6 = vsel %vm750_vm0, %v745_v2, 0.0  ;;  %v760_v7 = vsel %vm750_vm0, %v747_v5, 0.0  ;;  %v828_v28 = vld [vmem:[%s3906_s22] sm:$0xff]  ;;  %v829_v29 = vld [vmem:[%s3906_s22 + $0x8] sm:$0xff]  ;;  %v830_v30 = vld [vmem:[%s3906_s22 + $0x10] sm:$0xff] }
  0x2b   : > { %758 = vadd.xlane.f32.xlu1 %v757_v4  ;;  %v831_v31 = vld [vmem:[%s3906_s22 + $0x18] sm:$0xff]  ;;  %833 = vst.msk [vmem:[#allocation3] sm:$0xff] %vm832_vm1, %v828_v28  ;;  %834 = vst.msk [vmem:[#allocation3 + $0x8] sm:$0xff] %vm832_vm1, %v829_v29  ;;  %v2719_v46 = vld [vmem:[%s3907_s6] ss:$0 sm:$0xff] }
  0x2c   : > { %835 = vst.msk [vmem:[#allocation3 + $0x10] sm:$0xff] %vm832_vm1, %v830_v30  ;;  %837 = vst.msk [vmem:[#allocation3 + $0x20] sm:$0xff] %vm832_vm1, %v828_v28  ;;  %v2720_v51 = vld [vmem:[%s3908_s25] ss:$0 sm:$0xff] }
  0x2d   : > { %838 = vst.msk [vmem:[#allocation3 + $0x28] sm:$0xff] %vm832_vm1, %v829_v29  ;;  %839 = vst.msk [vmem:[#allocation3 + $0x30] sm:$0xff] %vm832_vm1, %v830_v30 }
  0x2e   : > { %755 = vadd.xlane.f32.xlu0 %v754_v6  ;;  %841 = vst.msk [vmem:[#allocation3 + $0x40] sm:$0xff] %vm832_vm1, %v828_v28  ;;  %842 = vst.msk [vmem:[#allocation3 + $0x48] sm:$0xff] %vm832_vm1, %v829_v29 }
  0x2f   : > { %761 = vadd.xlane.f32.xlu1 %v760_v7  ;;  %843 = vst.msk [vmem:[#allocation3 + $0x50] sm:$0xff] %vm832_vm1, %v830_v30  ;;  %845 = vst.msk [vmem:[#allocation3 + $0x60] sm:$0xff] %vm832_vm1, %v828_v28 }
  0x30   : > { %846 = vst.msk [vmem:[#allocation3 + $0x68] sm:$0xff] %vm832_vm1, %v829_v29  ;;  %847 = vst.msk [vmem:[#allocation3 + $0x70] sm:$0xff] %vm832_vm1, %v830_v30 }
  0x31   : > { %836 = vst.msk [vmem:[#allocation3 + $0x18] sm:$0xff] %vm832_vm1, %v831_v31  ;;  %840 = vst.msk [vmem:[#allocation3 + $0x38] sm:$0xff] %vm832_vm1, %v831_v31 }
  0x32   : > { %844 = vst.msk [vmem:[#allocation3 + $0x58] sm:$0xff] %vm832_vm1, %v831_v31  ;;  %848 = vst.msk [vmem:[#allocation3 + $0x78] sm:$0xff] %vm832_vm1, %v831_v31 }
  0xb7   : > { %v753_v8 = vpop.xlane.xlu0 %752 }
  0xb8   : > { %v759_v9 = vpop.xlane.xlu1 %758  ;;  %v764_v10 = vmul.f32 0.015625, %v753_v8 }
  0xb9   : > { %v766_v11 = vmul.f32 0.015625, %v759_v9 }
  0xba   : > { %v768_v12 = vsub.f32 %v744_v0, %v764_v10 }
  0xbb   : > { %v3437_v13 = vsub.f32 %v746_v1, %v766_v11  ;;  %v756_v14 = vpop.xlane.xlu0 %755 }
  0xbc   : > { %v762_v15 = vpop.xlane.xlu1 %761  ;;  %v765_v16 = vmul.f32 0.015625, %v756_v14  ;;  %v772_v18 = vmul.f32 %v768_v12, %v768_v12 }
  0xbd   : > { %v767_v17 = vmul.f32 0.015625, %v762_v15  ;;  %v774_v19 = vmul.f32 %v3437_v13, %v3437_v13 }
  0xbe   : > { %v769_v20 = vsub.f32 %v745_v2, %v765_v16  ;;  %v776_v22 = vsel %vm750_vm0, %v772_v18, 0.0 }
  0xbf   : > { %v771_v21 = vsub.f32 %v747_v5, %v767_v17  ;;  %777 = vadd.xlane.f32.xlu0 %v776_v22  ;;  %v782_v23 = vsel %vm750_vm0, %v774_v19, 0.0 }
  0xc0   : > { %v773_v24 = vmul.f32 %v769_v20, %v769_v20 }
  0xc1   : > { %v775_v25 = vmul.f32 %v771_v21, %v771_v21 }
  0xc2   : > { %v779_v26 = vsel %vm750_vm0, %v773_v24, 0.0 }
  0xc3   : > { %783 = vadd.xlane.f32.xlu0 %v782_v23  ;;  %780 = vadd.xlane.f32.xlu1 %v779_v26  ;;  %v785_v27 = vsel %vm750_vm0, %v775_v25, 0.0 }
  0xc7   : > { %786 = vadd.xlane.f32.xlu1 %v785_v27 }
 0x14c   : > { %v778_v32 = vpop.xlane.xlu0 %777 }
 0x14d   : > { %v788_v33 = vmul.f32 0.015625, %v778_v32 }
 0x14f   : > { %v792_v34 = vadd.f32 1e-12, %v788_v33 }
 0x150   : > { %v781_v35 = vpop.xlane.xlu1 %780  ;;  %v784_v36 = vpop.xlane.xlu0 %783 }
 0x151   : > { %2983 = vrsqrt.f32 %v792_v34  ;;  %v789_v37 = vmul.f32 0.015625, %v781_v35  ;;  %v790_v38 = vmul.f32 0.015625, %v784_v36 }
 0x153   : > { %v793_v39 = vadd.f32 1e-12, %v789_v37  ;;  %v794_v40 = vadd.f32 1e-12, %v790_v38 }
 0x154   : > { %v787_v41 = vpop.xlane.xlu1 %786 }
 0x155   : > { %2985 = vrsqrt.f32 %v793_v39  ;;  %v791_v42 = vmul.f32 0.015625, %v787_v41 }
 0x156   : > { %2987 = vrsqrt.f32 %v794_v40 }
 0x157   : > { %v795_v43 = vadd.f32 1e-12, %v791_v42 }
 0x159   : > { %2989 = vrsqrt.f32 %v795_v43 }
 0x15b   : > { %v2984_v44 = vpop.eup %2983 }
 0x15c   : > { %v800_v45 = vmul.f32 %v2984_v44, %v768_v12 }
 0x15e   : > { %v810_v49 = vmul.f32 %v2719_v46, %v800_v45 }
 0x15f   : > { %v2986_v47 = vpop.eup %2985 }
 0x160   : > { %v2988_v48 = vpop.eup %2987  ;;  %v801_v50 = vmul.f32 %v2986_v47, %v769_v20  ;;  %v820_v55 = vadd.f32 %v2720_v51, %v810_v49 }
 0x161   : > { %v802_v52 = vmul.f32 %v2988_v48, %v3437_v13 }
 0x162   : > { %v811_v53 = vmul.f32 %v2719_v46, %v801_v50 }
 0x163   : > { %v2990_v54 = vpop.eup %2989  ;;  %v812_v57 = vmul.f32 %v2719_v46, %v802_v52 }
 0x164   : > { %v821_v56 = vadd.f32 %v2720_v51, %v811_v53  ;;  %v803_v58 = vmul.f32 %v2990_v54, %v771_v21 }
 0x165   : > { %v822_v61 = vadd.f32 %v2720_v51, %v812_v57 }
 0x166   : > { %v824_v59 = vpack.c.bf16 %v821_v56, %v820_v55  ;;  %v813_v60 = vmul.f32 %v2719_v46, %v803_v58 }
 0x168   : > { %826 = vst.msk [vmem:[#allocation2] sm:$0xff] %vm750_vm0, %v824_v59  ;;  %v823_v62 = vadd.f32 %v2720_v51, %v813_v60 }
 0x16a   : > { %v825_v63 = vpack.c.bf16 %v823_v62, %v822_v61 }
 0x16c   : > { %827 = vst.msk [vmem:[#allocation2 + $0x8] sm:$0xff] %vm750_vm0, %v825_v63 }
 0x16d PF: > { %v3091_v0 = vld [vmem:[%s3367_s20 + $0x4] ss:$8 sps:$4 sm:$0xff]   ;;  %v3093_v1 = vld [vmem:[%s3367_s20] ss:$8 sps:$4 sm:$0xff]   ;;  %v3245_v2 = vmov 0   ;;  %s3909_s27 = sld [smem:[#allocation5_spill]]  ;;  %v861_v11 = vlaneseq  ;;  %s3910_s0 = scalar_lea.vmem %s3872_s7, %s3360_s29 }
 0x16e   : > { %950 = vmatprep.mubr.bf16.mxu1 %v3245_v2  ;;  %918 = vmatprep.subr.bf16.mxu1 %v3091_v0  ;;  %v3094_v3 = vld [vmem:[%s3367_s20 + $0x14] ss:$8 sps:$4 sm:$0xff]   ;;  %v3096_v4 = vld [vmem:[%s3367_s20 + $0x10] ss:$8 sps:$4 sm:$0xff]   ;;  %v3097_v5 = vld [vmem:[%s3367_s20 + $0x24] ss:$8 sps:$4 sm:$0xff]  }
 0x16f   : > { %919 = vmatpush1.bf16.msra.mxu1 %v3093_v1  ;;  %v3099_v6 = vld [vmem:[%s3367_s20 + $0x20] ss:$8 sps:$4 sm:$0xff]   ;;  %v3100_v7 = vld [vmem:[%s3367_s20 + $0x34] ss:$8 sps:$4 sm:$0xff]   ;;  %v3102_v8 = vld [vmem:[%s3367_s20 + $0x30] ss:$8 sps:$4 sm:$0xff]  }
 0x170   : > { %920 = vmatprep.subr.bf16.mxu1 %v3094_v3  ;;  %vm911_vm2 = vcmask 523264   ;;  %v849_v9 = vld [vmem:[#allocation2] sm:$0xff]  ;;  %v3494_v12 = vshrl.u32 %v861_v11, 7  ;;  %vm1155_vm3 = vcmask 130048   ;;  %s3246_s20 = smov 112   ;;  %s3247_s18 = smov 64  }
 0x171   : > { %s3248_s19 = smov 16   ;;  %s3249_s16 = smov 48   ;;  %vm1432_vm4 = vcmask 261120   ;;  %vm1813_vm5 = vcmask 392192  }
 0x172   : > { %v863_v13 = vsub.s32 0, %v3494_v12  ;;  %v867_v15 = vsub.s32 1, %v3494_v12  ;;  %s3250_s21 = smov 96   ;;  %s3251_s1 = smov 32  }
 0x173   : > { %921 = vmatpush1.bf16.msra.mxu1 %v3096_v4  ;;  %v850_v10 = vld [vmem:[#allocation2 + $0x8] sm:$0xff]  ;;  %v859_v14 = vld [vmem:[%s3909_s27] sm:$0x3]  ;;  %s3252_s6 = smov 80   ;;  %s3911_s27 = scalar_lea.vmem %s3873_s8, %s3360_s29 }
 0x174   : > { %922 = vmatprep.subr.bf16.mxu1 %v3097_v5  ;;  %v864_v16 = vrot.slane %v859_v14, %v863_v13  ;;  %v868_v18 = vrot.slane %v859_v14, %v867_v15  ;;  %p2785_p5 = scmp.ne.s32.totalorder %s3354_s28, 1 }
 0x177   : > { %923 = vmatpush1.bf16.msra.mxu1 %v3099_v6 }
 0x178   : > { %924 = vmatprep.subr.bf16.mxu1 %v3100_v7 }
 0x17b   : > { %925 = vmatpush1.bf16.msra.mxu1 %v3102_v8 }
 0x17e   : > { %2729 = vmatmul.mubr.msk.bf16.vlgmr.msra.gmra.mrb[0].mxu1 %vm911_vm2, %v849_v9 }
 0x17f   : > { %960 = vmatprep.mubr.bf16.mxu1 %v3245_v2 }
 0x186   : > { %2730 = vmatmul.mubr.msk.bf16.gmra.mrb[4].mxu1 %vm911_vm2, %v850_v10 }
 0x251   : > { %v952_v17 = vpop.f32.mrb[0].mxu1 }
 0x252   : > { %v953_v19 = vadd.f32 %v952_v17, %v864_v16  ;;  %v954_v20 = vpop.f32.mrb[1].mxu1 }
 0x253   : > { %v956_v21 = vpop.f32.mrb[2].mxu1  ;;  %v955_v24 = vadd.f32 %v954_v20, %v868_v18 }
 0x254   : > { %v957_v22 = vadd.f32 %v956_v21, %v864_v16  ;;  %v958_v23 = vpop.f32.mrb[3].mxu1  ;;  %v1099_v26 = vmul.f32 0.25, %v953_v19 }
 0x255   : > { %v959_v25 = vadd.f32 %v958_v23, %v868_v18 }
 0x256   : > { %977 = vrot.lane.b32.xlu1 %v957_v22, %s3246_s20  ;;  %v2991_v27 = vpack.i.bf16 %v957_v22, %v953_v19  ;;  %v1100_v28 = vmul.f32 0.25, %v957_v22 }
 0x257   : > { %v3031_v29 = vpack.i.bf16 %v959_v25, %v955_v24  ;;  %v3504_v31 = vpack.c.bf16 %v959_v25, %v955_v24 }
 0x258   : > { %2992 = vrot.lane.b32.xlu0 %v2991_v27, %s3247_s18  ;;  %v1115_v30 = vpack.c.bf16 %v1100_v28, %v1099_v26 }
 0x259   : > { %v962_v32 = vpop.f32.mrb[4].mxu1 }
 0x25a   : > { %v963_v33 = vadd.f32 %v962_v32, %v864_v16  ;;  %v964_v34 = vpop.f32.mrb[5].mxu1  ;;  %3007 = vrot.lane.b32.xlu1 %v2991_v27, %s3248_s19  ;;  %2875 = vmatprep.mubr.msk.bf16.mxu1 %vm1155_vm3, %v1115_v30 }
 0x25b   : > { %v965_v35 = vadd.f32 %v964_v34, %v868_v18  ;;  %v966_v36 = vpop.f32.mrb[6].mxu1 }
 0x25c   : > { %v967_v37 = vadd.f32 %v966_v36, %v864_v16  ;;  %v968_v38 = vpop.f32.mrb[7].mxu1  ;;  %2997 = vrot.lane.b32.xlu0 %v2991_v27, %s3249_s16  ;;  %v3509_v40 = vmul.f32 0.25, %v963_v33 }
 0x25d   : > { %v969_v39 = vadd.f32 %v968_v38, %v868_v18 }
 0x25e   : > { %v3011_v41 = vpack.i.bf16 %v967_v37, %v963_v33  ;;  %v3513_v43 = vmul.f32 0.25, %v967_v37 }
 0x25f   : > { %v3511_v42 = vpack.i.bf16 %v969_v39, %v965_v35  ;;  %v3515_v44 = vpack.c.bf16 %v969_v39, %v965_v35 }
 0x260   : > { %3012 = vrot.lane.b32.xlu1 %v3011_v41, %s3247_s18  ;;  %975 = vrot.lane.b32.xlu0 %v953_v19, %s3246_s20  ;;  %v1116_v45 = vpack.c.bf16 %v3513_v43, %v3509_v40 }
 0x264   : > { %3017 = vrot.lane.b32.xlu1 %v3011_v41, %s3249_s16  ;;  %987 = vrot.lane.b32.xlu0 %v953_v19, %s3250_s21 }
 0x268   : > { %989 = vrot.lane.b32.xlu1 %v957_v22, %s3250_s21  ;;  %3002 = vrot.lane.b32.xlu0 %v2991_v27, %s3251_s1 }
 0x26c   : > { %981 = vrot.lane.b32.xlu1 %v967_v37, %s3246_s20  ;;  %979 = vrot.lane.b32.xlu0 %v963_v33, %s3246_s20 }
 0x270   : > { %1001 = vrot.lane.b32.xlu1 %v957_v22, %s3252_s6  ;;  %991 = vrot.lane.b32.xlu0 %v963_v33, %s3250_s21 }
 0x274   : > { %3027 = vrot.lane.b32.xlu1 %v3011_v41, %s3248_s19  ;;  %3022 = vrot.lane.b32.xlu0 %v3011_v41, %s3251_s1 }
 0x278   : > { %993 = vrot.lane.b32.xlu1 %v967_v37, %s3250_s21  ;;  %999 = vrot.lane.b32.xlu0 %v953_v19, %s3252_s6 }
 0x27c   : > { %1005 = vrot.lane.b32.xlu1 %v967_v37, %s3252_s6  ;;  %1003 = vrot.lane.b32.xlu0 %v963_v33, %s3252_s6 }
 0x280   : > { %3032 = vrot.lane.b32.xlu1 %v3031_v29, %s3246_s20  ;;  %3047 = vrot.lane.b32.xlu0 %v3511_v42, %s3246_s20  ;;  %s3914_s20 = sld [smem:[#allocation14_spill]] (!%p2785_p5) }
 0x284   : > { %3037 = vrot.lane.b32.xlu1 %v3031_v29, %s3250_s21 }
 0x288   : > { %3042 = vrot.lane.b32.xlu1 %v3031_v29, %s3252_s6 }
 0x2c8   : > { %v978_v46 = vpop.permute.xlu1 %977 }
 0x2c9   : > { %v1104_v57 = vmul.f32 0.25, %v978_v46 }
 0x2ca   : > { %v2993_v47 = vpop.permute.xlu0 %2992 }
 0x2cb   : > { %v2995_v48 = vunpack.i.h.bf16 %v2993_v47  ;;  %v2994_v49 = vunpack.i.l.bf16 %v2993_v47 }
 0x2cc   : > { %v3008_v51 = vpop.permute.xlu1 %3007 }
 0x2cd   : > { %v1123_v50 = vpack.c.bf16 %v2995_v48, %v2994_v49  ;;  %v3010_v3 = vunpack.i.h.bf16 %v3008_v51  ;;  %v3009_v4 = vunpack.i.l.bf16 %v3008_v51 }
 0x2ce   : > { %v2998_v52 = vpop.permute.xlu0 %2997 }
 0x2cf   : > { %v3000_v53 = vunpack.i.h.bf16 %v2998_v52  ;;  %v2999_v54 = vunpack.i.l.bf16 %v2998_v52  ;;  %2959 = vmatprep.subr.msk.bf16.mxu1 %vm1155_vm3, %v1123_v50  ;;  %v1163_v55 = vsel %vm1155_vm3, %v1123_v50, 0  ;;  %v1129_v11 = vpack.c.bf16 %v3010_v3, %v3009_v4  ;;  %v1141_v4 = vld [vmem:[#allocation3 + $0x10] sm:$0xff] }
 0x2d0   : > { %2872 = vmatpush3.bf16.xpose.msra.mxu1 %v1163_v55 }
 0x2d1   : > { %v1125_v56 = vpack.c.bf16 %v3000_v53, %v2999_v54  ;;  %v1346_v33 = vsel %vm1155_vm3, %v1129_v11, 0 }
 0x2d2   : > { %v3013_v58 = vpop.permute.xlu1 %3012  ;;  %v976_v59 = vpop.permute.xlu0 %975 }
 0x2d3   : > { %v3015_v60 = vunpack.i.h.bf16 %v3013_v58  ;;  %v3014_v61 = vunpack.i.l.bf16 %v3013_v58  ;;  %v1103_v62 = vmul.f32 0.25, %v976_v59  ;;  %2961 = vmatprep.subr.msk.bf16.mxu0 %vm1155_vm3, %v1125_v56  ;;  %v1224_v63 = vsel %vm1155_vm3, %v1125_v56, 0 }
 0x2d4   : > { %2880 = vmatpush3.bf16.xpose.msra.mxu0 %v1224_v63 }
 0x2d5   : > { %v1124_v0 = vpack.c.bf16 %v3015_v60, %v3014_v61  ;;  %v1117_v1 = vpack.c.bf16 %v1104_v57, %v1103_v62 }
 0x2d6   : > { %v3018_v5 = vpop.permute.xlu1 %3017  ;;  %v988_v6 = vpop.permute.xlu0 %987 }
 0x2d7   : > { %v3020_v7 = vunpack.i.h.bf16 %v3018_v5  ;;  %v3019_v8 = vunpack.i.l.bf16 %v3018_v5  ;;  %2960 = vmatprep.subr.msk.bf16.mxu1 %vm1155_vm3, %v1124_v0  ;;  %2883 = vmatprep.mubr.msk.bf16.mxu0 %vm1155_vm3, %v1117_v1  ;;  %v1166_v9 = vsel %vm1155_vm3, %v1124_v0, 0  ;;  %v1107_v14 = vmul.f32 0.25, %v988_v6  ;;  %v1139_v5 = vld [vmem:[#allocation3] sm:$0xff] }
 0x2d8   : > { %2874 = vmatpush3.bf16.xpose.msra.mxu1 %v1166_v9 }
 0x2d9   : > { %v1126_v10 = vpack.c.bf16 %v3020_v7, %v3019_v8  ;;  %v1142_v7 = vld [vmem:[#allocation3 + $0x18] sm:$0xff] }
 0x2da   : > { %v990_v16 = vpop.permute.xlu1 %989  ;;  %v3003_v17 = vpop.permute.xlu0 %3002 }
 0x2db   : > { %v1108_v18 = vmul.f32 0.25, %v990_v16  ;;  %v3005_v19 = vunpack.i.h.bf16 %v3003_v17  ;;  %v3004_v20 = vunpack.i.l.bf16 %v3003_v17  ;;  %2962 = vmatprep.subr.msk.bf16.mxu0 %vm1155_vm3, %v1126_v10  ;;  %v1227_v21 = vsel %vm1155_vm3, %v1126_v10, 0 }
 0x2dc   : > { %2882 = vmatpush3.bf16.xpose.msra.mxu0 %v1227_v21  ;;  %v1146_v21 = vld [vmem:[#allocation3 + $0x38] sm:$0xff] }
 0x2dd   : > { %v1119_v22 = vpack.c.bf16 %v1108_v18, %v1107_v14  ;;  %v1127_v23 = vpack.c.bf16 %v3005_v19, %v3004_v20  ;;  %2965 = vmatprep.subr.msk.bf16.mxu0 %vm1155_vm3, %v1129_v11  ;;  %v1145_v11 = vld [vmem:[#allocation3 + $0x30] sm:$0xff]  ;;  %v1140_v18 = vld [vmem:[#allocation3 + $0x8] sm:$0xff]  ;;  %v1143_v19 = vld [vmem:[#allocation3 + $0x20] sm:$0xff] }
 0x2de   : > { %v982_v24 = vpop.permute.xlu1 %981  ;;  %v980_v25 = vpop.permute.xlu0 %979 }
 0x2df   : > { %v1106_v26 = vmul.f32 0.25, %v982_v24  ;;  %v1105_v27 = vmul.f32 0.25, %v980_v25  ;;  %2876 = vmatmul.mubr.msk.bf16.vlgmr.msra.gmra.mrb[8].mxu1 %vm1155_vm3, %v1116_v45  ;;  %2963 = vmatprep.subr.msk.bf16.mxu1 %vm1155_vm3, %v1127_v23  ;;  %v1285_v28 = vsel %vm1155_vm3, %v1127_v23, 0 }
 0x2e0   : > { %2888 = vmatpush3.bf16.xpose.msra.mxu1 %v1285_v28  ;;  %2891 = vmatprep.mubr.msk.bf16.mxu1 %vm1155_vm3, %v1119_v22 }
 0x2e1   : > { %v1118_v29 = vpack.c.bf16 %v1106_v26, %v1105_v27 }
 0x2e2   : > { %v1002_v30 = vpop.permute.xlu1 %1001  ;;  %v992_v32 = vpop.permute.xlu0 %991 }
 0x2e3   : > { %2884 = vmatmul.mubr.msk.bf16.vlgmr.msra.gmra.mrb[0].mxu0 %vm1155_vm3, %v1118_v29  ;;  %v1112_v46 = vmul.f32 0.25, %v1002_v30  ;;  %v1109_v54 = vmul.f32 0.25, %v992_v32 }
 0x2e4   : > { %2896 = vmatpush3.bf16.xpose.msra.mxu0 %v1346_v33  ;;  %v1144_v33 = vld [vmem:[#allocation3 + $0x28] sm:$0xff] }
 0x2e6   : > { %v3028_v34 = vpop.permute.xlu1 %3027  ;;  %v3023_v35 = vpop.permute.xlu0 %3022 }
 0x2e7   : > { %v3030_v36 = vunpack.i.h.bf16 %v3028_v34  ;;  %v3029_v37 = vunpack.i.l.bf16 %v3028_v34  ;;  %v3025_v38 = vunpack.i.h.bf16 %v3023_v35  ;;  %v3024_v39 = vunpack.i.l.bf16 %v3023_v35 }
 0x2e9   : > { %v1130_v40 = vpack.c.bf16 %v3030_v36, %v3029_v37  ;;  %v1128_v41 = vpack.c.bf16 %v3025_v38, %v3024_v39 }
 0x2ea   : > { %v994_v43 = vpop.permute.xlu1 %993  ;;  %v1000_v45 = vpop.permute.xlu0 %999 }
 0x2eb   : > { %v1111_v47 = vmul.f32 0.25, %v1000_v45  ;;  %2964 = vmatprep.subr.msk.bf16.mxu1 %vm1155_vm3, %v1128_v41  ;;  %2966 = vmatprep.subr.msk.bf16.mxu0 %vm1155_vm3, %v1130_v40  ;;  %v1288_v48 = vsel %vm1155_vm3, %v1128_v41, 0  ;;  %v1349_v49 = vsel %vm1155_vm3, %v1130_v40, 0  ;;  %v1110_v50 = vmul.f32 0.25, %v994_v43  ;;  %v1149_v41 = vld [vmem:[#allocation3 + $0x50] sm:$0xff] }
 0x2ec   : > { %2890 = vmatpush3.bf16.xpose.msra.mxu1 %v1288_v48  ;;  %2898 = vmatpush3.bf16.xpose.msra.mxu0 %v1349_v49  ;;  %v1153_v43 = vld [vmem:[#allocation3 + $0x70] sm:$0xff] }
 0x2ed   : > { %v1121_v51 = vpack.c.bf16 %v1112_v46, %v1111_v47  ;;  %2903 = vmatprep.subr.bf16.mxu1 %v3504_v31  ;;  %v1120_v57 = vpack.c.bf16 %v1110_v50, %v1109_v54  ;;  %v1147_v46 = vld [vmem:[#allocation3 + $0x40] sm:$0xff] }
 0x2ee   : > { %v1006_v52 = vpop.permute.xlu1 %1005  ;;  %v1004_v53 = vpop.permute.xlu0 %1003 }
 0x2ef   : > { %v1114_v55 = vmul.f32 0.25, %v1006_v52  ;;  %v1113_v56 = vmul.f32 0.25, %v1004_v53  ;;  %2899 = vmatprep.mubr.msk.bf16.mxu0 %vm1155_vm3, %v1121_v51  ;;  %v1150_v52 = vld [vmem:[#allocation3 + $0x58] sm:$0xff] }
 0x2f0   : > { %v1154_v53 = vld [vmem:[#allocation3 + $0x78] sm:$0xff] }
 0x2f1   : > { %v1122_v58 = vpack.c.bf16 %v1114_v55, %v1113_v56 }
 0x2f2   : > { %v3033_v59 = vpop.permute.xlu1 %3032 }
 0x2f3   : > { %v3035_v60 = vunpack.i.h.bf16 %v3033_v59  ;;  %v3034_v61 = vunpack.i.l.bf16 %v3033_v59  ;;  %2892 = vmatmul.mubr.msk.bf16.vlgmr.msra.gmra.mrb[12].mxu1 %vm1155_vm3, %v1120_v57  ;;  %2900 = vmatmul.mubr.msk.bf16.vlgmr.msra.gmra.mrb[4].mxu0 %vm1155_vm3, %v1122_v58 }
 0x2f4   : > { %2904 = vmatpush3.bf16.msra.mxu1 %v3504_v31 }
 0x2f5   : > { %2905 = vmatprep.subr.bf16.mxu1 %v3515_v44  ;;  %v3568_v63 = vpack.c.bf16 %v3035_v60, %v3034_v61  ;;  %v1151_v60 = vld [vmem:[#allocation3 + $0x60] sm:$0xff] }
 0x2f6   : > { %v3038_v62 = vpop.permute.xlu1 %3037 }
 0x2f7   : > { %v3040_v0 = vunpack.i.h.bf16 %v3038_v62  ;;  %v3039_v1 = vunpack.i.l.bf16 %v3038_v62 }
 0x2f8   : > { %2906 = vmatpush3.bf16.msra.mxu1 %v3515_v44 }
 0x2f9   : > { %v1135_v3 = vpack.c.bf16 %v3040_v0, %v3039_v1  ;;  %2911 = vmatprep.subr.bf16.mxu1 %v3568_v63 }
 0x2fb   : > { %2919 = vmatprep.subr.bf16.mxu0 %v1135_v3 }
 0x2fc   : > { %2920 = vmatpush3.bf16.msra.mxu0 %v1135_v3 }
 0x3b2   : > { %v2877_v6 = vpop.f32.mrb[8].mxu1 }
 0x3b3   : > { %v1211_v8 = vadd.f32 %v2877_v6, %v1141_v4  ;;  %v1202_v31 = vpop.f32.mrb[9].mxu1 }
 0x3b4   : > { %v1203_v9 = vadd.f32 %v1202_v31, %v1139_v5  ;;  %v2878_v10 = vpop.f32.mrb[10].mxu1 }
 0x3b5   : > { %v1404_v14 = vmul.f32 1.442695, %v1211_v8  ;;  %v1214_v16 = vadd.f32 %v2878_v10, %v1142_v7  ;;  %v1205_v17 = vpop.f32.mrb[11].mxu1  ;;  %v1148_v8 = vld [vmem:[#allocation3 + $0x48] sm:$0xff] }
 0x3b6   : > { %v1400_v44 = vmul.f32 1.442695, %v1203_v9  ;;  %v2885_v20 = vpop.f32.mrb[0].mxu0  ;;  %v1206_v25 = vadd.f32 %v1205_v17, %v1140_v18 }
 0x3b7   : > { %3135 = vpow2.f32 %v1404_v14  ;;  %v1272_v22 = vadd.f32 %v2885_v20, %v1145_v11  ;;  %v1263_v23 = vpop.f32.mrb[1].mxu0  ;;  %v1406_v24 = vmul.f32 1.442695, %v1214_v16 }
 0x3b8   : > { %v1264_v26 = vadd.f32 %v1263_v23, %v1143_v19  ;;  %v2886_v27 = vpop.f32.mrb[2].mxu0  ;;  %3137 = vpow2.f32 %v1400_v44  ;;  %v1402_v34 = vmul.f32 1.442695, %v1206_v25  ;;  %v1152_v19 = vld [vmem:[#allocation3 + $0x68] sm:$0xff] }
 0x3b9   : > { %v1412_v28 = vmul.f32 1.442695, %v1272_v22  ;;  %v1275_v29 = vadd.f32 %v2886_v27, %v1146_v21  ;;  %v1266_v30 = vpop.f32.mrb[3].mxu0 }
 0x3ba   : > { %v1408_v32 = vmul.f32 1.442695, %v1264_v26  ;;  %v1267_v36 = vadd.f32 %v1266_v30, %v1144_v33 }
 0x3bb   : > { %3139 = vpow2.f32 %v1412_v28  ;;  %v1414_v35 = vmul.f32 1.442695, %v1275_v29 }
 0x3bc   : > { %3141 = vpow2.f32 %v1406_v24  ;;  %v1410_v38 = vmul.f32 1.442695, %v1267_v36 }
 0x3bd   : > { %3143 = vpow2.f32 %v1408_v32 }
 0x3be   : > { %3145 = vpow2.f32 %v1402_v34 }
 0x3bf   : > { %3147 = vpow2.f32 %v1414_v35 }
 0x3c0   : > { %3149 = vpow2.f32 %v1410_v38 }
 0x3c1   : > { %v3572_v37 = vpop.eup %3135 }
 0x3c2   : > { %v1439_v39 = vsel %vm1432_vm4, %v3572_v37, 0.0  ;;  %v3576_v40 = vpop.eup %3137 }
 0x3c3   : > { %1440 = vadd.xlane.f32.xlu0 %v1439_v39  ;;  %v1433_v51 = vsel %vm1432_vm4, %v3576_v40, 0.0 }
 0x3c5   : > { %v3578_v45 = vpop.eup %3139 }
 0x3c6   : > { %v3580_v47 = vpop.eup %3141  ;;  %v2893_v48 = vpop.f32.mrb[12].mxu1  ;;  %v1451_v50 = vsel %vm1432_vm4, %v3578_v45, 0.0 }
 0x3c7   : > { %v2901_v49 = vpop.f32.mrb[4].mxu0  ;;  %v3586_v54 = vpop.eup %3143  ;;  %v1333_v55 = vadd.f32 %v2893_v48, %v1149_v41  ;;  %1452 = vadd.xlane.f32.xlu1 %v1451_v50  ;;  %1434 = vadd.xlane.f32.xlu0 %v1433_v51  ;;  %v1442_v9 = vsel %vm1432_vm4, %v3580_v47, 0.0 }
 0x3c8   : > { %v1394_v56 = vadd.f32 %v2901_v49, %v1153_v43  ;;  %v1324_v57 = vpop.f32.mrb[13].mxu1  ;;  %v1385_v58 = vpop.f32.mrb[5].mxu0  ;;  %v1445_v31 = vsel %vm1432_vm4, %v3586_v54, 0.0 }
 0x3c9   : > { %v1325_v59 = vadd.f32 %v1324_v57, %v1147_v46  ;;  %v2894_v61 = vpop.f32.mrb[14].mxu1  ;;  %v2902_v62 = vpop.f32.mrb[6].mxu0  ;;  %v1420_v0 = vmul.f32 1.442695, %v1333_v55  ;;  %v1386_v16 = vadd.f32 %v1385_v58, %v1151_v60 }
 0x3ca   : > { %v1428_v1 = vmul.f32 1.442695, %v1394_v56  ;;  %v1336_v3 = vadd.f32 %v2894_v61, %v1150_v52  ;;  %v1397_v4 = vadd.f32 %v2902_v62, %v1154_v53  ;;  %v1327_v5 = vpop.f32.mrb[15].mxu1  ;;  %v1388_v6 = vpop.f32.mrb[7].mxu0 }
 0x3cb   : > { %v3588_v7 = vpop.eup %3145  ;;  %3151 = vpow2.f32 %v1420_v0  ;;  %1446 = vadd.xlane.f32.xlu1 %v1445_v31  ;;  %1443 = vadd.xlane.f32.xlu0 %v1442_v9  ;;  %v1416_v14 = vmul.f32 1.442695, %v1325_v59  ;;  %v1328_v18 = vadd.f32 %v1327_v5, %v1148_v8  ;;  %v1424_v22 = vmul.f32 1.442695, %v1386_v16  ;;  %v3048_v50 = vpop.permute.xlu0 %3047 }
 0x3cc   : > { %v3594_v10 = vpop.eup %3147  ;;  %v1422_v11 = vmul.f32 1.442695, %v1336_v3  ;;  %3153 = vpow2.f32 %v1428_v1  ;;  %v1430_v17 = vmul.f32 1.442695, %v1397_v4  ;;  %v1436_v44 = vsel %vm1432_vm4, %v3588_v7, 0.0  ;;  %v3640_v51 = vpop.permute.xlu1 %3042 }
 0x3cd   : > { %v1454_v20 = vsel %vm1432_vm4, %v3594_v10, 0.0  ;;  %v3600_v21 = vpop.eup %3149  ;;  %v1418_v23 = vmul.f32 1.442695, %v1328_v18  ;;  %v1389_v24 = vadd.f32 %v1388_v6, %v1152_v19 }
 0x3ce   : > { %3155 = vpow2.f32 %v1422_v11  ;;  %v1448_v25 = vsel %vm1432_vm4, %v3600_v21, 0.0 }
 0x3cf   : > { %1437 = vadd.xlane.f32.xlu1 %v1436_v44  ;;  %1455 = vadd.xlane.f32.xlu0 %v1454_v20  ;;  %3157 = vpow2.f32 %v1416_v14  ;;  %v1426_v27 = vmul.f32 1.442695, %v1389_v24  ;;  %v3050_v20 = vunpack.i.h.bf16 %v3048_v50 }
 0x3d0   : > { %3159 = vpow2.f32 %v1430_v17 }
 0x3d1   : > { %3161 = vpow2.f32 %v1424_v22  ;;  %v3049_v22 = vunpack.i.l.bf16 %v3048_v50 }
 0x3d2   : > { %3163 = vpow2.f32 %v1418_v23 }
 0x3d3   : > { %1449 = vadd.xlane.f32.xlu0 %v1448_v25  ;;  %3165 = vpow2.f32 %v1426_v27 }
 0x3d5   : > { %v3604_v26 = vpop.eup %3151 }
 0x3d6   : > { %v1463_v28 = vsel %vm1432_vm4, %v3604_v26, 0.0  ;;  %v3608_v29 = vpop.eup %3153 }
 0x3d7   : > { %1464 = vadd.xlane.f32.xlu1 %v1463_v28  ;;  %v1475_v34 = vsel %vm1432_vm4, %v3608_v29, 0.0 }
 0x3d8   : > { %v3610_v30 = vpop.eup %3155 }
 0x3d9   : > { %v3612_v32 = vpop.eup %3157  ;;  %v1466_v33 = vsel %vm1432_vm4, %v3610_v30, 0.0 }
 0x3da   : > { %v3618_v35 = vpop.eup %3159  ;;  %1467 = vadd.xlane.f32.xlu0 %v1466_v33  ;;  %v1457_v39 = vsel %vm1432_vm4, %v3612_v32, 0.0 }
 0x3db   : > { %1476 = vadd.xlane.f32.xlu1 %v1475_v34  ;;  %v3620_v36 = vpop.eup %3161  ;;  %v1478_v38 = vsel %vm1432_vm4, %v3618_v35, 0.0 }
 0x3dc   : > { %v3626_v41 = vpop.eup %3163  ;;  %v1469_v46 = vsel %vm1432_vm4, %v3620_v36, 0.0 }
 0x3dd   : > { %v1460_v43 = vsel %vm1432_vm4, %v3626_v41, 0.0  ;;  %v3632_v48 = vpop.eup %3165 }
 0x3de   : > { %1479 = vadd.xlane.f32.xlu0 %v1478_v38  ;;  %v1472_v49 = vsel %vm1432_vm4, %v3632_v48, 0.0 }
 0x3df   : > { %1458 = vadd.xlane.f32.xlu1 %v1457_v39 }
 0x3e2   : > { %1461 = vadd.xlane.f32.xlu0 %v1460_v43 }
 0x3e3   : > { %1470 = vadd.xlane.f32.xlu1 %v1469_v46  ;;  %v1134_v46 = vpack.c.bf16 %v3050_v20, %v3049_v22 }
 0x3e6   : > { %1473 = vadd.xlane.f32.xlu0 %v1472_v49  ;;  %v3045_v49 = vunpack.i.h.bf16 %v3640_v51 }
 0x3f4   : > { %3057 = vrot.lane.b32.xlu1 %v3511_v42, %s3252_s6 }
 0x3fc   : > { %3052 = vrot.lane.b32.xlu0 %v3511_v42, %s3250_s21 }
 0x450   : > { %v1441_v52 = vpop.xlane.xlu0 %1440 }
 0x451   : > { %v1483_v60 = vmax.f32 %v1441_v52, 1e-30 }
 0x454   : > { %v1453_v53 = vpop.xlane.xlu1 %1452  ;;  %v1435_v55 = vpop.xlane.xlu0 %1434 }
 0x455   : > { %v1481_v58 = vmax.f32 %v1435_v55, 1e-30  ;;  %v1487_v4 = vmax.f32 %v1453_v53, 1e-30 }
 0x458   : > { %v1447_v56 = vpop.xlane.xlu1 %1446  ;;  %v1444_v57 = vpop.xlane.xlu0 %1443 }
 0x459   : > { %v1484_v59 = vmax.f32 %v1444_v57, 1e-30  ;;  %v1485_v0 = vmax.f32 %v1447_v56, 1e-30 }
 0x45b   : > { %3167 = vrcp.f32 %v1484_v59 }
 0x45c   : > { %v1438_v61 = vpop.xlane.xlu1 %1437  ;;  %v1456_v62 = vpop.xlane.xlu0 %1455  ;;  %3169 = vrcp.f32 %v1481_v58 }
 0x45d   : > { %v1482_v1 = vmax.f32 %v1438_v61, 1e-30  ;;  %3171 = vrcp.f32 %v1483_v60  ;;  %v1488_v3 = vmax.f32 %v1456_v62, 1e-30 }
 0x45f   : > { %3173 = vrcp.f32 %v1482_v1 }
 0x460   : > { %v1450_v42 = vpop.xlane.xlu0 %1449  ;;  %3175 = vrcp.f32 %v1485_v0 }
 0x461   : > { %v1486_v5 = vmax.f32 %v1450_v42, 1e-30  ;;  %3177 = vrcp.f32 %v1488_v3 }
 0x463   : > { %3179 = vrcp.f32 %v1486_v5 }
 0x464   : > { %v1465_v6 = vpop.xlane.xlu1 %1464  ;;  %3181 = vrcp.f32 %v1487_v4 }
 0x465   : > { %v3168_v8 = vpop.eup %3167  ;;  %v1491_v43 = vmax.f32 %v1465_v6, 1e-30 }
 0x466   : > { %v3170_v31 = vpop.eup %3169  ;;  %v1516_v17 = vmul.f32 %v3168_v8, %v3580_v47 }
 0x467   : > { %v3172_v9 = vpop.eup %3171  ;;  %v1468_v11 = vpop.xlane.xlu0 %1467  ;;  %v1513_v18 = vmul.f32 %v3170_v31, %v3576_v40 }
 0x468   : > { %v1477_v14 = vpop.xlane.xlu1 %1476  ;;  %v1515_v23 = vmul.f32 %v3172_v9, %v3572_v37  ;;  %v1492_v25 = vmax.f32 %v1468_v11, 1e-30  ;;  %v3044_v37 = vunpack.i.l.bf16 %v3640_v51 }
 0x469   : > { %v3174_v16 = vpop.eup %3173  ;;  %v1495_v58 = vmax.f32 %v1477_v14, 1e-30 }
 0x46a   : > { %v1514_v19 = vmul.f32 %v3174_v16, %v3588_v7  ;;  %v3176_v44 = vpop.eup %3175  ;;  %v1530_v39 = vpack.c.bf16 %v1516_v17, %v1515_v23  ;;  %3183 = vrcp.f32 %v1492_v25  ;;  %v1137_v51 = vpack.c.bf16 %v3045_v49, %v3044_v37 }
 0x46b   : > { %v3178_v24 = vpop.eup %3177  ;;  %v1480_v27 = vpop.xlane.xlu0 %1479  ;;  %v1517_v40 = vmul.f32 %v3176_v44, %v3586_v54 }
 0x46c   : > { %v1459_v28 = vpop.xlane.xlu1 %1458  ;;  %v1529_v33 = vpack.c.bf16 %v1514_v19, %v1513_v18  ;;  %v1520_v50 = vmul.f32 %v3178_v24, %v3594_v10  ;;  %v1496_v52 = vmax.f32 %v1480_v27, 1e-30 }
 0x46d   : > { %v3180_v34 = vpop.eup %3179  ;;  %v1489_v38 = vmax.f32 %v1459_v28, 1e-30  ;;  %v3104_v28 = vld [vmem:[%s3382_s17 + $0x8] sm:$0xff]  }
 0x46e   : > { %2907 = vmatprep.mubr.msk.bf16.mxu1 %vm1432_vm4, %v1529_v33  ;;  %v1518_v47 = vmul.f32 %v3180_v34, %v3600_v21  ;;  %v3182_v7 = vpop.eup %3181 }
 0x46f   : > { %2908 = vmatmul.mubr.msk.bf16.vlgmr.msra.gmra.mrb[16].mxu1 %vm1432_vm4, %v1530_v39  ;;  %v1462_v53 = vpop.xlane.xlu0 %1461  ;;  %3185 = vrcp.f32 %v1489_v38  ;;  %v1519_v57 = vmul.f32 %v3182_v7, %v3578_v45 }
 0x470   : > { %2912 = vmatpush3.bf16.msra.mxu1 %v3568_v63  ;;  %v1471_v55 = vpop.xlane.xlu1 %1470  ;;  %v1531_v56 = vpack.c.bf16 %v1518_v47, %v1517_v40  ;;  %v1490_v54 = vmax.f32 %v1462_v53, 1e-30  ;;  %3187 = vrcp.f32 %v1491_v43  ;;  %v3105_v43 = vld [vmem:[%s3382_s17 + $0x10] sm:$0xff]   ;;  %v3106_v40 = vld [vmem:[%s3382_s17 + $0x18] sm:$0xff]  }
 0x471   : > { %v1493_v21 = vmax.f32 %v1471_v55, 1e-30  ;;  %2913 = vmatprep.subr.bf16.mxu1 %v1134_v46  ;;  %v1532_v60 = vpack.c.bf16 %v1520_v50, %v1519_v57 }
 0x472   : > { %2915 = vmatprep.mubr.msk.bf16.mxu1 %vm1432_vm4, %v1531_v56  ;;  %3189 = vrcp.f32 %v1490_v54 }
 0x473   : > { %3191 = vrcp.f32 %v1496_v52  ;;  %v1474_v10 = vpop.xlane.xlu0 %1473 }
 0x474   : > { %2914 = vmatpush3.bf16.msra.mxu1 %v1134_v46  ;;  %v3058_v59 = vpop.permute.xlu1 %3057  ;;  %3193 = vrcp.f32 %v1493_v21  ;;  %v1494_v63 = vmax.f32 %v1474_v10, 1e-30  ;;  %v3184_v42 = vpop.eup %3183 }
 0x475   : > { %v3060_v61 = vunpack.i.h.bf16 %v3058_v59  ;;  %v3059_v62 = vunpack.i.l.bf16 %v3058_v59  ;;  %2927 = vmatprep.subr.bf16.mxu1 %v1137_v51  ;;  %3195 = vrcp.f32 %v1495_v58  ;;  %v1524_v31 = vmul.f32 %v3184_v42, %v3610_v30 }
 0x476   : > { %3197 = vrcp.f32 %v1494_v63 }
 0x477   : > { %v1138_v0 = vpack.c.bf16 %v3060_v61, %v3059_v62  ;;  %2916 = vmatmul.mubr.msk.bf16.vlgmr.msra.gmra.mrb[20].mxu1 %vm1432_vm4, %v1532_v60  ;;  %v3053_v45 = vpop.permute.xlu0 %3052 }
 0x478   : > { %2928 = vmatpush3.bf16.msra.mxu1 %v1137_v51  ;;  %v3055_v1 = vunpack.i.h.bf16 %v3053_v45  ;;  %v3054_v3 = vunpack.i.l.bf16 %v3053_v45 }
 0x479   : > { %2929 = vmatprep.subr.bf16.mxu1 %v1138_v0  ;;  %v3186_v4 = vpop.eup %3185 }
 0x47a   : > { %v1136_v5 = vpack.c.bf16 %v3055_v1, %v3054_v3  ;;  %v3188_v6 = vpop.eup %3187  ;;  %v1521_v11 = vmul.f32 %v3186_v4, %v3612_v32 }
 0x47b   : > { %v1523_v17 = vmul.f32 %v3188_v6, %v3604_v26 }
 0x47c   : > { %2930 = vmatpush3.bf16.msra.mxu1 %v1138_v0  ;;  %v3190_v8 = vpop.eup %3189  ;;  %2921 = vmatprep.subr.bf16.mxu0 %v1136_v5 }
 0x47d   : > { %v3192_v9 = vpop.eup %3191  ;;  %2922 = vmatpush3.bf16.msra.mxu0 %v1136_v5  ;;  %v1522_v14 = vmul.f32 %v3190_v8, %v3626_v41  ;;  %v1534_v22 = vpack.c.bf16 %v1524_v31, %v1523_v17 }
 0x47e   : > { %v3194_v16 = vpop.eup %3193  ;;  %v1528_v20 = vmul.f32 %v3192_v9, %v3618_v35 }
 0x47f   : > { %v3196_v18 = vpop.eup %3195  ;;  %v1533_v19 = vpack.c.bf16 %v1522_v14, %v1521_v11  ;;  %v1525_v30 = vmul.f32 %v3194_v16, %v3620_v36  ;;  %v3103_v36 = vld [vmem:[%s3382_s17] sm:$0xff]  }
 0x480   : > { %v3198_v44 = vpop.eup %3197  ;;  %v1527_v32 = vmul.f32 %v3196_v18, %v3608_v29  ;;  %2935 = vmatprep.subr.bf16.mxu0 %v3103_v36 }
 0x481   : > { %2923 = vmatprep.mubr.msk.bf16.mxu0 %vm1432_vm4, %v1533_v19  ;;  %v1526_v23 = vmul.f32 %v3198_v44, %v3632_v48 }
 0x482   : > { %2924 = vmatmul.mubr.msk.bf16.vlgmr.msra.gmra.mrb[8].mxu0 %vm1432_vm4, %v1534_v22  ;;  %v1536_v26 = vpack.c.bf16 %v1528_v20, %v1527_v32 }
 0x483   : > { %v1535_v41 = vpack.c.bf16 %v1526_v23, %v1525_v30  ;;  %2936 = vmatpush3.bf16.msra.mxu0 %v3103_v36 }
 0x484   : > { %2937 = vmatprep.subr.bf16.mxu0 %v3104_v28 }
 0x485   : > { %2931 = vmatprep.mubr.msk.bf16.mxu1 %vm1432_vm4, %v1535_v41  ;;  %v2747_v41 = vld [vmem:[%s3910_s0] ss:$0 sm:$0xff] }
 0x486   : > { %2932 = vmatmul.mubr.msk.bf16.vlgmr.msra.gmra.mrb[24].mxu1 %vm1432_vm4, %v1536_v26 }
 0x487   : > { %2097 = vmatprep.mubr.bf16.mxu1 %v3245_v2  ;;  %2938 = vmatpush3.bf16.msra.mxu0 %v3104_v28 }
 0x488   : > { %2939 = vmatprep.subr.bf16.mxu0 %v3105_v43 }
 0x48b   : > { %2940 = vmatpush3.bf16.msra.mxu0 %v3105_v43 }
 0x48c   : > { %2941 = vmatprep.subr.bf16.mxu0 %v3106_v40 }
 0x48f   : > { %2942 = vmatpush3.bf16.msra.mxu0 %v3106_v40 }
 0x542   : > { %v2909_v35 = vpop.f32.mrb[16].mxu1 }
 0x543   : > { %v1577_v24 = vpop.f32.mrb[17].mxu1 }
 0x544   : > { %v2910_v25 = vpop.f32.mrb[18].mxu1 }
 0x545   : > { %v1580_v27 = vpop.f32.mrb[19].mxu1 }
 0x54a   : > { %v2917_v29 = vpop.f32.mrb[20].mxu1 }
 0x54b   : > { %v1632_v48 = vpop.f32.mrb[21].mxu1 }
 0x54c   : > { %v2918_v33 = vpop.f32.mrb[22].mxu1 }
 0x54d   : > { %v3061_v34 = vpack.i.bf16 %v2918_v33, %v2917_v29  ;;  %v1635_v38 = vpop.f32.mrb[23].mxu1 }
 0x54e   : > { %v3066_v39 = vpack.i.bf16 %v1635_v38, %v1632_v48  ;;  %v3232_v48 = vld [vmem:[#allocation2 + $0x8] sm:$0xff] }
 0x54f   : > { %3062 = vrot.lane.b32.xlu1 %v3061_v34, %s3248_s19  ;;  %v1916_v33 = vunpack.c.l.bf16 %v3232_v48  ;;  %v1917_v43 = vunpack.c.h.bf16 %v3232_v48 }
 0x550   : > { %3067 = vrot.lane.b32.xlu0 %v3066_v39, %s3248_s19  ;;  %s3912_s19 = scalar_lea.vmem %s3874_s9, %s3360_s29 }
 0x555   : > { %v2925_v47 = vpop.f32.mrb[8].mxu0 }
 0x556   : > { %v1687_v7 = vpop.f32.mrb[9].mxu0 }
 0x557   : > { %v2926_v46 = vpop.f32.mrb[10].mxu0 }
 0x558   : > { %v3071_v49 = vpack.i.bf16 %v2926_v46, %v2925_v47  ;;  %v1690_v37 = vpop.f32.mrb[11].mxu0 }
 0x559   : > { %v3076_v50 = vpack.i.bf16 %v1690_v37, %v1687_v7  ;;  %v2933_v52 = vpop.f32.mrb[24].mxu1 }
 0x55a   : > { %v1742_v53 = vpop.f32.mrb[25].mxu1  ;;  %3072 = vrot.lane.b32.xlu1 %v3071_v49, %s3251_s1 }
 0x55b   : > { %v2934_v55 = vpop.f32.mrb[26].mxu1  ;;  %3077 = vrot.lane.b32.xlu0 %v3076_v50, %s3251_s1 }
 0x55c   : > { %v3086_v56 = vpack.i.bf16 %v2934_v55, %v2933_v52  ;;  %v1745_v54 = vpop.f32.mrb[27].mxu1 }
 0x55d   : > { %v3081_v21 = vpack.i.bf16 %v1745_v54, %v1742_v53 }
 0x55e   : > { %3087 = vrot.lane.b32.xlu1 %v3086_v56, %s3249_s16 }
 0x55f   : > { %3082 = vrot.lane.b32.xlu0 %v3081_v21, %s3249_s16 }
 0x5c1   : > { %v3063_v57 = vpop.permute.xlu1 %3062 }
 0x5c2   : > { %v3068_v58 = vpop.permute.xlu0 %3067  ;;  %v3065_v51 = vunpack.i.h.bf16 %v3063_v57  ;;  %v3064_v10 = vunpack.i.l.bf16 %v3063_v57 }
 0x5c3   : > { %v3070_v60 = vunpack.i.h.bf16 %v3068_v58  ;;  %v3069_v63 = vunpack.i.l.bf16 %v3068_v58 }
 0x5c4   : > { %v1808_v3 = vsel %vm1155_vm3, %v2910_v25, %v3065_v51  ;;  %v1807_v42 = vsel %vm1155_vm3, %v2909_v35, %v3064_v10  ;;  %v3231_v35 = vld [vmem:[#allocation2] sm:$0xff] }
 0x5c5   : > { %v1806_v5 = vsel %vm1155_vm3, %v1580_v27, %v3070_v60  ;;  %v1805_v6 = vsel %vm1155_vm3, %v1577_v24, %v3069_v63  ;;  %v1914_v24 = vunpack.c.l.bf16 %v3231_v35  ;;  %v1915_v29 = vunpack.c.h.bf16 %v3231_v35 }
 0x5cc   : > { %v3073_v59 = vpop.permute.xlu1 %3072 }
 0x5cd   : > { %v3078_v61 = vpop.permute.xlu0 %3077  ;;  %v3075_v62 = vunpack.i.h.bf16 %v3073_v59  ;;  %v3074_v0 = vunpack.i.l.bf16 %v3073_v59 }
 0x5ce   : > { %v3080_v45 = vunpack.i.h.bf16 %v3078_v61  ;;  %v3079_v1 = vunpack.i.l.bf16 %v3078_v61 }
 0x5cf   : > { %v1812_v11 = vsel %vm1432_vm4, %v1808_v3, %v3075_v62  ;;  %v1811_v14 = vsel %vm1432_vm4, %v1807_v42, %v3074_v0 }
 0x5d0   : > { %v3088_v4 = vpop.permute.xlu1 %3087  ;;  %v1810_v18 = vsel %vm1432_vm4, %v1806_v5, %v3080_v45  ;;  %v1809_v19 = vsel %vm1432_vm4, %v1805_v6, %v3079_v1  ;;  %v3109_v5 = vld [vmem:[%s3395_s2 + $0x4] ss:$8 sps:$4 sm:$0xff]   ;;  %v3107_v6 = vld [vmem:[%s3395_s2] ss:$8 sps:$4 sm:$0xff]  }
 0x5d1   : > { %v3090_v8 = vunpack.i.h.bf16 %v3088_v4  ;;  %v3089_v31 = vunpack.i.l.bf16 %v3088_v4  ;;  %v3083_v9 = vpop.permute.xlu0 %3082  ;;  %2065 = vmatprep.subr.bf16.mxu1 %v3109_v5 }
 0x5d2   : > { %v3085_v16 = vunpack.i.h.bf16 %v3083_v9  ;;  %v3084_v17 = vunpack.i.l.bf16 %v3083_v9  ;;  %2066 = vmatpush1.bf16.msra.mxu1 %v3107_v6  ;;  %v3115_v9 = vld [vmem:[%s3395_s2 + $0x24] ss:$8 sps:$4 sm:$0xff]  }
 0x5d3   : > { %v1816_v44 = vsel %vm1813_vm5, %v1811_v14, %v3089_v31  ;;  %v1817_v20 = vsel %vm1813_vm5, %v1812_v11, %v3090_v8  ;;  %v3112_v8 = vld [vmem:[%s3395_s2 + $0x14] ss:$8 sps:$4 sm:$0xff]   ;;  %v3110_v31 = vld [vmem:[%s3395_s2 + $0x10] ss:$8 sps:$4 sm:$0xff]   ;;  %v3113_v11 = vld [vmem:[%s3395_s2 + $0x20] ss:$8 sps:$4 sm:$0xff]  }
 0x5d4   : > { %v1819_v22 = vpack.c.bf16 %v1817_v20, %v1816_v44  ;;  %v1814_v30 = vsel %vm1813_vm5, %v1809_v19, %v3084_v17  ;;  %v1815_v23 = vsel %vm1813_vm5, %v1810_v18, %v3085_v16  ;;  %2067 = vmatprep.subr.bf16.mxu1 %v3112_v8  ;;  %v3118_v14 = vld [vmem:[%s3395_s2 + $0x34] ss:$8 sps:$4 sm:$0xff]   ;;  %v3116_v16 = vld [vmem:[%s3395_s2 + $0x30] ss:$8 sps:$4 sm:$0xff]  }
 0x5d5   : > { %v1818_v32 = vpack.c.bf16 %v1815_v23, %v1814_v30 }
 0x5d6   : > { %2068 = vmatpush1.bf16.msra.mxu1 %v3110_v31 }
 0x5d7   : > { %2943 = vmatprep.mubr.msk.bf16.mxu0 %vm911_vm2, %v1818_v32  ;;  %2069 = vmatprep.subr.bf16.mxu1 %v3115_v9 }
 0x5d8   : > { %2944 = vmatmul.mubr.msk.bf16.vlgmr.msra.gmra.mrb[12].mxu0 %vm911_vm2, %v1819_v22 }
 0x5da   : > { %2070 = vmatpush1.bf16.msra.mxu1 %v3113_v11 }
 0x5db   : > { %2071 = vmatprep.subr.bf16.mxu1 %v3118_v14 }
 0x5de   : > { %2072 = vmatpush1.bf16.msra.mxu1 %v3116_v16 }
 0x6ab   : > { %v2945_v26 = vpop.f32.mrb[12].mxu0 }
 0x6ac   : > { %v1899_v25 = vpop.f32.mrb[13].mxu0  ;;  %v1908_v27 = vadd.f32 %v2945_v26, %v2747_v41 }
 0x6ad   : > { %v1900_v36 = vadd.f32 %v2747_v41, %v1899_v25  ;;  %v2946_v28 = vpop.f32.mrb[14].mxu0  ;;  %v2754_v25 = vld [vmem:[%s3911_s27] ss:$0 sm:$0xff] }
 0x6ae   : > { %v1902_v34 = vpop.f32.mrb[15].mxu0  ;;  %v1911_v40 = vadd.f32 %v2946_v28, %v2747_v41  ;;  %v1920_v46 = vadd.f32 %v1916_v33, %v1908_v27  ;;  %v2755_v33 = vld [vmem:[%s3912_s19] ss:$0 sm:$0xff] }
 0x6af   : > { %v1903_v38 = vadd.f32 %v2747_v41, %v1902_v34  ;;  %v1918_v39 = vadd.f32 %v1914_v24, %v1900_v36 }
 0x6b0   : > { %v1930_v37 = vsel %vm911_vm2, %v1920_v46, 0.0  ;;  %v1921_v50 = vadd.f32 %v1917_v43, %v1911_v40 }
 0x6b1   : > { %v1924_v47 = vsel %vm911_vm2, %v1918_v39, 0.0  ;;  %v1919_v7 = vadd.f32 %v1915_v29, %v1903_v38 }
 0x6b2   : > { %1925 = vadd.xlane.f32.xlu0 %v1924_v47  ;;  %v1933_v52 = vsel %vm911_vm2, %v1921_v50, 0.0 }
 0x6b3   : > { %v1927_v49 = vsel %vm911_vm2, %v1919_v7, 0.0 }
 0x6b4   : > { %1928 = vadd.xlane.f32.xlu1 %v1927_v49 }
 0x6b6   : > { %1931 = vadd.xlane.f32.xlu0 %v1930_v37 }
 0x6ba   : > { %1934 = vadd.xlane.f32.xlu0 %v1933_v52 }
 0x73f   : > { %v1926_v53 = vpop.xlane.xlu0 %1925 }
 0x740   : > { %v1937_v55 = vmul.f32 0.015625, %v1926_v53  ;;  %v3119_v53 = vld [vmem:[%s3406_s3 + $0x40] sm:$0xff]  }
 0x741   : > { %v1929_v56 = vpop.xlane.xlu1 %1928  ;;  %2837 = vmatprep.subr.bf16.mxu0 %v3119_v53 }
 0x742   : > { %v1941_v54 = vsub.f32 %v1918_v39, %v1937_v55  ;;  %v1938_v21 = vmul.f32 0.015625, %v1929_v56  ;;  %v3120_v55 = vld [vmem:[%s3406_s3] sm:$0xff]   ;;  %v3121_v56 = vld [vmem:[%s3406_s3 + $0x48] sm:$0xff]  }
 0x743   : > { %v1932_v57 = vpop.xlane.xlu0 %1931  ;;  %2838 = vmatpush3.bf16.msra.mxu0 %v3120_v55 }
 0x744   : > { %v1942_v58 = vsub.f32 %v1919_v7, %v1938_v21  ;;  %v1939_v51 = vmul.f32 0.015625, %v1932_v57  ;;  %v1945_v10 = vmul.f32 %v1941_v54, %v1941_v54  ;;  %2839 = vmatprep.subr.bf16.mxu0 %v3121_v56  ;;  %v3124_v21 = vld [vmem:[%s3406_s3 + $0x10] sm:$0xff]   ;;  %v3125_v57 = vld [vmem:[%s3406_s3 + $0x58] sm:$0xff]  }
 0x746   : > { %v1943_v59 = vsub.f32 %v1920_v46, %v1939_v51  ;;  %v1949_v60 = vsel %vm911_vm2, %v1945_v10, 0.0  ;;  %v1946_v63 = vmul.f32 %v1942_v58, %v1942_v58  ;;  %v3127_v51 = vld [vmem:[%s3406_s3 + $0x60] sm:$0xff]  }
 0x747   : > { %1950 = vadd.xlane.f32.xlu1 %v1949_v60  ;;  %v1935_v61 = vpop.xlane.xlu0 %1934  ;;  %v3128_v10 = vld [vmem:[%s3406_s3 + $0x20] sm:$0xff]   ;;  %v3130_v60 = vld [vmem:[%s3406_s3 + $0x28] sm:$0xff]  }
 0x748   : > { %v1940_v62 = vmul.f32 0.015625, %v1935_v61  ;;  %v1952_v0 = vsel %vm911_vm2, %v1946_v63, 0.0  ;;  %v1947_v45 = vmul.f32 %v1943_v59, %v1943_v59  ;;  %v3131_v63 = vld [vmem:[%s3406_s3 + $0x70] sm:$0xff]  }
 0x749   : > { %1953 = vadd.xlane.f32.xlu0 %v1952_v0  ;;  %v3132_v61 = vld [vmem:[%s3406_s3 + $0x30] sm:$0xff]   ;;  %v3134_v0 = vld [vmem:[%s3406_s3 + $0x38] sm:$0xff]  }
 0x74a   : > { %v1944_v1 = vsub.f32 %v1921_v50, %v1940_v62  ;;  %v1955_v3 = vsel %vm911_vm2, %v1947_v45, 0.0  ;;  %v3133_v62 = vld [vmem:[%s3406_s3 + $0x78] sm:$0xff]   ;;  %v2007_v45 = vld [vmem:[%s3400_s26] sm:$0x3]  ;;  %s3915_s26 = sld [smem:[#allocation15_spill]] (!%p2785_p5) }
 0x74b   : > { %1956 = vadd.xlane.f32.xlu1 %v1955_v3  ;;  %v2016_v3 = vrot.slane %v2007_v45, %v867_v15 }
 0x74c   : > { %v1948_v42 = vmul.f32 %v1944_v1, %v1944_v1 }
 0x74e   : > { %v1958_v4 = vsel %vm911_vm2, %v1948_v42, 0.0 }
 0x74f   : > { %1959 = vadd.xlane.f32.xlu0 %v1958_v4 }
 0x7d4   : > { %v1951_v17 = vpop.xlane.xlu1 %1950 }
 0x7d5   : > { %v1961_v18 = vmul.f32 0.015625, %v1951_v17 }
 0x7d6   : > { %v1954_v19 = vpop.xlane.xlu0 %1953 }
 0x7d7   : > { %v1965_v44 = vadd.f32 1e-12, %v1961_v18  ;;  %v1962_v20 = vmul.f32 0.015625, %v1954_v19 }
 0x7d8   : > { %v1957_v22 = vpop.xlane.xlu1 %1956 }
 0x7d9   : > { %3199 = vrsqrt.f32 %v1965_v44  ;;  %v1966_v30 = vadd.f32 1e-12, %v1962_v20  ;;  %v1963_v23 = vmul.f32 0.015625, %v1957_v22 }
 0x7db   : > { %3201 = vrsqrt.f32 %v1966_v30  ;;  %v1967_v32 = vadd.f32 1e-12, %v1963_v23 }
 0x7dc   : > { %v1960_v41 = vpop.xlane.xlu0 %1959 }
 0x7dd   : > { %3203 = vrsqrt.f32 %v1967_v32  ;;  %v1964_v26 = vmul.f32 0.015625, %v1960_v41 }
 0x7df   : > { %v1968_v35 = vadd.f32 1e-12, %v1964_v26 }
 0x7e1   : > { %3205 = vrsqrt.f32 %v1968_v35 }
 0x7e3   : > { %v3200_v24 = vpop.eup %3199 }
 0x7e4   : > { %v1973_v27 = vmul.f32 %v3200_v24, %v1941_v54  ;;  %v3123_v54 = vld [vmem:[%s3406_s3 + $0x50] sm:$0xff]  }
 0x7e5   : > { %v3202_v36 = vpop.eup %3201 }
 0x7e6   : > { %v1983_v28 = vmul.f32 %v2754_v25, %v1973_v27  ;;  %v1974_v29 = vmul.f32 %v3202_v36, %v1942_v58  ;;  %v3126_v58 = vld [vmem:[%s3406_s3 + $0x18] sm:$0xff]  }
 0x7e7   : > { %v3204_v48 = vpop.eup %3203 }
 0x7e8   : > { %v1984_v34 = vmul.f32 %v2754_v25, %v1974_v29  ;;  %v1975_v38 = vmul.f32 %v3204_v48, %v1943_v59  ;;  %v3725_v39 = vadd.f32 %v2755_v33, %v1983_v28  ;;  %v3129_v59 = vld [vmem:[%s3406_s3 + $0x68] sm:$0xff]  }
 0x7ea   : > { %v3727_v43 = vadd.f32 %v2755_v33, %v1984_v34  ;;  %v1985_v46 = vmul.f32 %v2754_v25, %v1975_v38 }
 0x7eb   : > { %v3206_v40 = vpop.eup %3205 }
 0x7ec   : > { %v1976_v47 = vmul.f32 %v3206_v40, %v1944_v1  ;;  %v1997_v7 = vpack.c.bf16 %v3727_v43, %v3725_v39  ;;  %v3735_v50 = vadd.f32 %v2755_v33, %v1985_v46  ;;  %v2012_v1 = vrot.slane %v2007_v45, %v863_v13 }
 0x7ee   : > { %2764 = vmatmul.mubr.msk.bf16.vlgmr.msra.gmra.mrb[28].mxu1 %vm911_vm2, %v1997_v7  ;;  %v1986_v49 = vmul.f32 %v2754_v25, %v1976_v47 }
 0x7ef   : > { %2107 = vmatprep.mubr.bf16.mxu1 %v3245_v2  ;;  %v3122_v2 = vld [vmem:[%s3406_s3 + $0x8] sm:$0xff]  }
 0x7f0   : > { %v3733_v37 = vadd.f32 %v2755_v33, %v1986_v49  ;;  %2840 = vmatpush3.bf16.msra.mxu0 %v3122_v2 }
 0x7f1   : > { %2841 = vmatprep.subr.bf16.mxu0 %v3123_v54 }
 0x7f2   : > { %v1998_v52 = vpack.c.bf16 %v3733_v37, %v3735_v50 }
 0x7f4   : > { %2842 = vmatpush3.bf16.msra.mxu0 %v3124_v21 }
 0x7f5   : > { %2843 = vmatprep.subr.bf16.mxu0 %v3125_v57 }
 0x7f6   : > { %2765 = vmatmul.mubr.msk.bf16.gmra.mrb[32].mxu1 %vm911_vm2, %v1998_v52 }
 0x7f8   : > { %2844 = vmatpush3.bf16.msra.mxu0 %v3126_v58 }
 0x7f9   : > { %2845 = vmatprep.subr.bf16.mxu0 %v3127_v51 }
 0x7fc   : > { %2846 = vmatpush3.bf16.msra.mxu0 %v3128_v10 }
 0x7fd   : > { %2847 = vmatprep.subr.bf16.mxu0 %v3129_v59 }
 0x800   : > { %2848 = vmatpush3.bf16.msra.mxu0 %v3130_v60 }
 0x801   : > { %2849 = vmatprep.subr.bf16.mxu0 %v3131_v63 }
 0x804   : > { %2850 = vmatpush3.bf16.msra.mxu0 %v3132_v61 }
 0x805   : > { %2851 = vmatprep.subr.bf16.mxu0 %v3133_v62 }
 0x808   : > { %2852 = vmatpush3.bf16.msra.mxu0 %v3134_v0 }
 0x8c1   : > { %v2099_v42 = vpop.f32.mrb[28].mxu1 }
 0x8c2   : > { %v3761_v4 = vadd.f32 %v2099_v42, %v2012_v1  ;;  %v2101_v5 = vpop.f32.mrb[29].mxu1 }
 0x8c3   : > { %v3763_v6 = vadd.f32 %v2101_v5, %v2016_v3  ;;  %v2103_v8 = vpop.f32.mrb[30].mxu1 }
 0x8c4   : > { %v2126_v31 = vmul.f32 0.044715, %v3761_v4  ;;  %v3766_v9 = vadd.f32 %v2103_v8, %v2012_v1  ;;  %v2105_v11 = vpop.f32.mrb[31].mxu1  ;;  %v2118_v8 = vmul.f32 0.5, %v3761_v4 }
 0x8c5   : > { %v2127_v14 = vmul.f32 0.044715, %v3763_v6  ;;  %v3769_v16 = vadd.f32 %v2105_v11, %v2016_v3 }
 0x8c6   : > { %v2134_v13 = vmul.f32 %v2126_v31, %v3761_v4  ;;  %v2128_v12 = vmul.f32 0.044715, %v3766_v9  ;;  %v2120_v31 = vmul.f32 0.5, %v3766_v9 }
 0x8c7   : > { %v2135_v15 = vmul.f32 %v2127_v14, %v3763_v6  ;;  %v2129_v17 = vmul.f32 0.044715, %v3769_v16  ;;  %v2119_v14 = vmul.f32 0.5, %v3763_v6 }
 0x8c8   : > { %v2142_v18 = vmul.f32 %v2134_v13, %v3761_v4  ;;  %v2136_v19 = vmul.f32 %v2128_v12, %v3766_v9  ;;  %v2121_v13 = vmul.f32 0.5, %v3769_v16 }
 0x8c9   : > { %v2143_v44 = vmul.f32 %v2135_v15, %v3763_v6  ;;  %v2137_v20 = vmul.f32 %v2129_v17, %v3769_v16  ;;  %v2109_v22 = vpop.f32.mrb[32].mxu1 }
 0x8ca   : > { %v2150_v30 = vadd.f32 %v2142_v18, %v3761_v4  ;;  %v2144_v23 = vmul.f32 %v2136_v19, %v3766_v9  ;;  %v3781_v32 = vadd.f32 %v2109_v22, %v2012_v1  ;;  %v2111_v41 = vpop.f32.mrb[33].mxu1 }
 0x8cb   : > { %v2145_v26 = vmul.f32 %v2137_v20, %v3769_v16  ;;  %v3784_v35 = vadd.f32 %v2111_v41, %v2016_v3  ;;  %v2113_v24 = vpop.f32.mrb[34].mxu1  ;;  %v2151_v25 = vadd.f32 %v2143_v44, %v3763_v6 }
 0x8cc   : > { %v2158_v27 = vmul.f32 0.7978846, %v2150_v30  ;;  %v2152_v36 = vadd.f32 %v2144_v23, %v3766_v9  ;;  %v2130_v28 = vmul.f32 0.044715, %v3781_v32  ;;  %v2114_v29 = vadd.f32 %v2113_v24, %v2012_v1  ;;  %v2115_v48 = vpop.f32.mrb[35].mxu1 }
 0x8cd   : > { %v2131_v33 = vmul.f32 0.044715, %v3784_v35  ;;  %v2116_v34 = vadd.f32 %v2115_v48, %v2016_v3  ;;  %v2153_v38 = vadd.f32 %v2145_v26, %v3769_v16  ;;  %v2159_v40 = vmul.f32 0.7978846, %v2151_v25 }
 0x8ce   : > { %3207 = vtanh.f32 %v2158_v27  ;;  %v2160_v47 = vmul.f32 0.7978846, %v2152_v36  ;;  %v2138_v7 = vmul.f32 %v2130_v28, %v3781_v32  ;;  %v2132_v46 = vmul.f32 0.044715, %v2114_v29 }
 0x8cf   : > { %v2139_v49 = vmul.f32 %v2131_v33, %v3784_v35  ;;  %v2133_v52 = vmul.f32 0.044715, %v2116_v34  ;;  %v2161_v53 = vmul.f32 0.7978846, %v2153_v38  ;;  %3209 = vtanh.f32 %v2159_v40 }
 0x8d0   : > { %3211 = vtanh.f32 %v2160_v47  ;;  %v2146_v55 = vmul.f32 %v2138_v7, %v3781_v32  ;;  %v2140_v56 = vmul.f32 %v2132_v46, %v2114_v29  ;;  %v2122_v6 = vmul.f32 0.5, %v3781_v32 }
 0x8d1   : > { %v2147_v2 = vmul.f32 %v2139_v49, %v3784_v35  ;;  %v2141_v54 = vmul.f32 %v2133_v52, %v2116_v34  ;;  %3213 = vtanh.f32 %v2161_v53  ;;  %v2124_v9 = vmul.f32 0.5, %v2114_v29 }
 0x8d2   : > { %v2148_v21 = vmul.f32 %v2140_v56, %v2114_v29  ;;  %v2154_v57 = vadd.f32 %v2146_v55, %v3781_v32  ;;  %v2123_v24 = vmul.f32 0.5, %v3784_v35  ;;  %v2125_v25 = vmul.f32 0.5, %v2116_v34  ;;  %v2766_v32 = vld [vmem:[%s732_s4] ss:$0 sm:$0xff] }
 0x8d3   : > { %v2149_v58 = vmul.f32 %v2141_v54, %v2116_v34  ;;  %v2155_v51 = vadd.f32 %v2147_v2, %v3784_v35 }
 0x8d4   : > { %v2156_v10 = vadd.f32 %v2148_v21, %v2114_v29  ;;  %v2162_v59 = vmul.f32 0.7978846, %v2154_v57 }
 0x8d5   : > { %v2157_v60 = vadd.f32 %v2149_v58, %v2116_v34  ;;  %v2163_v63 = vmul.f32 0.7978846, %v2155_v51 }
 0x8d6   : > { %v2164_v61 = vmul.f32 0.7978846, %v2156_v10  ;;  %3215 = vtanh.f32 %v2162_v59 }
 0x8d7   : > { %v2165_v62 = vmul.f32 0.7978846, %v2157_v60  ;;  %3217 = vtanh.f32 %v2163_v63 }
 0x8d8   : > { %v3208_v0 = vpop.eup %3207  ;;  %3219 = vtanh.f32 %v2164_v61 }
 0x8d9   : > { %v3210_v45 = vpop.eup %3209  ;;  %v2174_v1 = vadd.f32 1.0, %v3208_v0  ;;  %3221 = vtanh.f32 %v2165_v62 }
 0x8da   : > { %v3212_v3 = vpop.eup %3211  ;;  %v2175_v42 = vadd.f32 1.0, %v3210_v45 }
 0x8db   : > { %v3214_v5 = vpop.eup %3213  ;;  %v2176_v11 = vadd.f32 1.0, %v3212_v3  ;;  %v2182_v15 = vmul.f32 %v2174_v1, %v2118_v8 }
 0x8dc   : > { %v2177_v12 = vadd.f32 1.0, %v3214_v5  ;;  %v2183_v18 = vmul.f32 %v2175_v42, %v2119_v14 }
 0x8dd   : > { %v2184_v17 = vmul.f32 %v2176_v11, %v2120_v31 }
 0x8de   : > { %v2185_v19 = vmul.f32 %v2177_v12, %v2121_v13 }
 0x8df   : > { %v2190_v44 = vpack.c.bf16 %v2184_v17, %v2182_v15 }
 0x8e0   : > { %v3216_v20 = vpop.eup %3215  ;;  %v2191_v22 = vpack.c.bf16 %v2185_v19, %v2183_v18 }
 0x8e1   : > { %v3218_v30 = vpop.eup %3217  ;;  %v2178_v23 = vadd.f32 1.0, %v3216_v20 }
 0x8e2   : > { %v3220_v41 = vpop.eup %3219  ;;  %2361 = vmatprep.mubr.bf16.mxu0 %v2191_v22  ;;  %v2179_v4 = vadd.f32 1.0, %v3218_v30 }
 0x8e3   : > { %v3222_v26 = vpop.eup %3221  ;;  %2362 = vmatmul.mubr.bf16.vlgmr.msra.gmra.mrb[16].mxu0 %v2190_v44  ;;  %v2180_v16 = vadd.f32 1.0, %v3220_v41  ;;  %v2186_v36 = vmul.f32 %v2178_v23, %v2122_v6 }
 0x8e4   : > { %v2181_v27 = vadd.f32 1.0, %v3222_v26  ;;  %v2187_v48 = vmul.f32 %v2179_v4, %v2123_v24 }
 0x8e5   : > { %v2188_v28 = vmul.f32 %v2180_v16, %v2124_v9 }
 0x8e6   : > { %v2189_v33 = vmul.f32 %v2181_v27, %v2125_v25 }
 0x8e7   : > { %v2192_v38 = vpack.c.bf16 %v2188_v28, %v2186_v36  ;;  %v2783_v36 = vld [vmem:[%s735_s5] ss:$0 sm:$0xff] }
 0x8e8   : > { %v2193_v40 = vpack.c.bf16 %v2189_v33, %v2187_v48 }
 0x8ea   : > { %2369 = vmatprep.mubr.bf16.mxu0 %v2193_v40  ;;  %v2784_v40 = vld [vmem:[%s738_s24] ss:$0 sm:$0xff]  ;;  %s3913_s24 = sld [smem:[#allocation13_spill]] (!%p2785_p5) }
 0x8eb   : > { %2370 = vmatmul.mubr.bf16.gmra.mrb[20].mxu0 %v2192_v38 }
 0x9b6   : > { %v2853_v47 = vpop.f32.mrb[16].mxu0 }
 0x9b7   : > { %v2854_v29 = vpop.f32.mrb[17].mxu0 }
 0x9b8   : > { %v2855_v7 = vadd.f32 %v2854_v29, %v2853_v47  ;;  %v2856_v46 = vpop.f32.mrb[18].mxu0 }
 0x9b9   : > { %v2857_v35 = vpop.f32.mrb[19].mxu0 }
 0x9ba   : > { %v2364_v34 = vadd.f32 %v2855_v7, %v2766_v32  ;;  %v2858_v49 = vadd.f32 %v2857_v35, %v2856_v46 }
 0x9bc   : > { %v2367_v52 = vadd.f32 %v2858_v49, %v2766_v32  ;;  %v2378_v53 = vadd.f32 %v2364_v34, %v3725_v39 }
 0x9be   : > { %v2859_v55 = vpop.f32.mrb[20].mxu0  ;;  %v2384_v56 = vsel %vm911_vm2, %v2378_v53, 0.0  ;;  %v2379_v2 = vadd.f32 %v2367_v52, %v3727_v43 }
 0x9bf   : > { %2385 = vadd.xlane.f32.xlu1 %v2384_v56  ;;  %v2860_v54 = vpop.f32.mrb[21].mxu0 }
 0x9c0   : > { %v2861_v21 = vadd.f32 %v2860_v54, %v2859_v55  ;;  %v2862_v57 = vpop.f32.mrb[22].mxu0  ;;  %v2387_v58 = vsel %vm911_vm2, %v2379_v2, 0.0  ;;  %v3233_v54 = vld [vmem:[%s3913_s24] sm:$0xff] (!%p2785_p5)  }
 0x9c1   : > { %2388 = vadd.xlane.f32.xlu0 %v2387_v58  ;;  %v2863_v51 = vpop.f32.mrb[23].mxu0  ;;  %2947 = vmatprep.subr.bf16.mxu0 (!%p2785_p5), %v3233_v54  ;;  %v3236_v58 = vld [vmem:[%s3913_s24 + $0x18] sm:$0xff] (!%p2785_p5)  }
 0x9c2   : > { %v2372_v10 = vadd.f32 %v2861_v21, %v2766_v32  ;;  %v2864_v59 = vadd.f32 %v2863_v51, %v2862_v57  ;;  %v3234_v21 = vld [vmem:[%s3913_s24 + $0x8] sm:$0xff] (!%p2785_p5)   ;;  %2948 = vmatpush3.bf16.msra.mxu0 (!%p2785_p5), %v3233_v54  ;;  %v3235_v57 = vld [vmem:[%s3913_s24 + $0x10] sm:$0xff] (!%p2785_p5)   ;;  %v2786_v51 = vld [vmem:[%s3914_s20] ss:$0 sm:$0xff] (!%p2785_p5) }
 0x9c3   : > { %2949 = vmatprep.subr.bf16.mxu0 (!%p2785_p5), %v3234_v21 }
 0x9c4   : > { %v2375_v60 = vadd.f32 %v2864_v59, %v2766_v32  ;;  %v2380_v63 = vadd.f32 %v2372_v10, %v3735_v50 }
 0x9c6   : > { %v2390_v39 = vsel %vm911_vm2, %v2380_v63, 0.0  ;;  %v2381_v61 = vadd.f32 %v2375_v60, %v3733_v37  ;;  %2950 = vmatpush3.bf16.msra.mxu0 (!%p2785_p5), %v3234_v21 }
 0x9c7   : > { %2391 = vadd.xlane.f32.xlu1 %v2390_v39  ;;  %2951 = vmatprep.subr.bf16.mxu0 (!%p2785_p5), %v3235_v57 }
 0x9c8   : > { %v2393_v43 = vsel %vm911_vm2, %v2381_v61, 0.0 }
 0x9c9   : > { %2394 = vadd.xlane.f32.xlu0 %v2393_v43 }
 0x9ca   : > { %2952 = vmatpush3.bf16.msra.mxu0 (!%p2785_p5), %v3235_v57 }
 0x9cb   : > { %2953 = vmatprep.subr.bf16.mxu0 (!%p2785_p5), %v3236_v58 }
 0x9ce   : > { %2954 = vmatpush3.bf16.msra.mxu0 (!%p2785_p5), %v3236_v58 }
 0xa4c   : > { %v2386_v62 = vpop.xlane.xlu1 %2385 }
 0xa4d   : > { %v2396_v0 = vmul.f32 0.015625, %v2386_v62 }
 0xa4e   : > { %v2389_v45 = vpop.xlane.xlu0 %2388 }
 0xa4f   : > { %v2400_v1 = vsub.f32 %v2378_v53, %v2396_v0  ;;  %v2397_v3 = vmul.f32 0.015625, %v2389_v45 }
 0xa51   : > { %v2401_v42 = vsub.f32 %v2379_v2, %v2397_v3  ;;  %v2404_v5 = vmul.f32 %v2400_v1, %v2400_v1 }
 0xa53   : > { %v2408_v8 = vsel %vm911_vm2, %v2404_v5, 0.0  ;;  %v2405_v31 = vmul.f32 %v2401_v42, %v2401_v42 }
 0xa54   : > { %2409 = vadd.xlane.f32.xlu1 %v2408_v8  ;;  %v2392_v50 = vpop.xlane.xlu1 %2391 }
 0xa55   : > { %v2398_v11 = vmul.f32 0.015625, %v2392_v50  ;;  %v2411_v14 = vsel %vm911_vm2, %v2405_v31, 0.0 }
 0xa56   : > { %2412 = vadd.xlane.f32.xlu0 %v2411_v14  ;;  %v2395_v37 = vpop.xlane.xlu0 %2394 }
 0xa57   : > { %v2402_v13 = vsub.f32 %v2380_v63, %v2398_v11  ;;  %v2399_v12 = vmul.f32 0.015625, %v2395_v37 }
 0xa59   : > { %v2403_v15 = vsub.f32 %v2381_v61, %v2399_v12  ;;  %v2406_v17 = vmul.f32 %v2402_v13, %v2402_v13 }
 0xa5b   : > { %v2414_v18 = vsel %vm911_vm2, %v2406_v17, 0.0  ;;  %v2407_v19 = vmul.f32 %v2403_v15, %v2403_v15 }
 0xa5c   : > { %2415 = vadd.xlane.f32.xlu1 %v2414_v18 }
 0xa5d   : > { %v2417_v44 = vsel %vm911_vm2, %v2407_v19, 0.0 }
 0xa5e   : > { %2418 = vadd.xlane.f32.xlu0 %v2417_v44 }
 0xae1   : > { %v2410_v20 = vpop.xlane.xlu1 %2409 }
 0xae2   : > { %v2420_v22 = vmul.f32 0.015625, %v2410_v20 }
 0xae3   : > { %v2413_v30 = vpop.xlane.xlu0 %2412 }
 0xae4   : > { %v2424_v23 = vadd.f32 1e-12, %v2420_v22  ;;  %v2421_v41 = vmul.f32 0.015625, %v2413_v30 }
 0xae6   : > { %3223 = vrsqrt.f32 %v2424_v23  ;;  %v2425_v4 = vadd.f32 1e-12, %v2421_v41 }
 0xae8   : > { %3225 = vrsqrt.f32 %v2425_v4 }
 0xae9   : > { %v2416_v26 = vpop.xlane.xlu1 %2415 }
 0xaea   : > { %v2422_v6 = vmul.f32 0.015625, %v2416_v26 }
 0xaeb   : > { %v2419_v9 = vpop.xlane.xlu0 %2418 }
 0xaec   : > { %v2426_v16 = vadd.f32 1e-12, %v2422_v6  ;;  %v2423_v24 = vmul.f32 0.015625, %v2419_v9 }
 0xaee   : > { %3227 = vrsqrt.f32 %v2426_v16  ;;  %v2427_v25 = vadd.f32 1e-12, %v2423_v24 }
 0xaf0   : > { %v3224_v27 = vpop.eup %3223  ;;  %3229 = vrsqrt.f32 %v2427_v25 }
 0xaf1   : > { %v2432_v28 = vmul.f32 %v3224_v27, %v2400_v1 }
 0xaf2   : > { %v3226_v48 = vpop.eup %3225 }
 0xaf3   : > { %v2442_v33 = vmul.f32 %v2783_v36, %v2432_v28  ;;  %v2433_v38 = vmul.f32 %v3226_v48, %v2401_v42 }
 0xaf5   : > { %v2443_v47 = vmul.f32 %v2783_v36, %v2433_v38  ;;  %v2452_v32 = vadd.f32 %v2784_v40, %v2442_v33 }
 0xaf7   : > { %v2453_v29 = vadd.f32 %v2784_v40, %v2443_v47 }
 0xaf8   : > { %v3228_v7 = vpop.eup %3227 }
 0xaf9   : > { %v2456_v46 = vpack.c.bf16 %v2453_v29, %v2452_v32  ;;  %v2434_v35 = vmul.f32 %v3228_v7, %v2402_v13 }
 0xafa   : > { %v3230_v34 = vpop.eup %3229 }
 0xafb   : > { %2458 = vst.msk [vmem:[#allocation2] sm:$0xff] %vm911_vm2, %v2456_v46  ;;  %v2444_v49 = vmul.f32 %v2783_v36, %v2434_v35  ;;  %v2435_v52 = vmul.f32 %v3230_v34, %v2403_v15  ;;  %2955 = vmatprep.mubr.msk.bf16.mxu0 (!%p2785_p5), %vm911_vm2, %v2456_v46 }
 0xafd   : > { %v2445_v53 = vmul.f32 %v2783_v36, %v2435_v52  ;;  %v2454_v55 = vadd.f32 %v2784_v40, %v2444_v49  ;;  %2463 = sbr.rel (%p2785_p5) target bundleno = 3037 (0xbdd), region = 100 }
 0xaff   : > { %v2455_v56 = vadd.f32 %v2784_v40, %v2445_v53 }
 0xb01   : > { %v2457_v2 = vpack.c.bf16 %v2455_v56, %v2454_v55 }
 0xb03   : > { %2459 = vst.msk [vmem:[#allocation2 + $0x8] sm:$0xff] %vm911_vm2, %v2457_v2  ;;  %2956 = vmatmul.mubr.msk.bf16.vlgmr.msra.gmra.mrb[0].mxu0 (!%p2785_p5), %vm911_vm2, %v2457_v2 }
 0xbd6   : > { %v2957_v10 = vpop.f32.mrb[0].mxu0 }
 0xbd7   : > { %v2552_v59 = vadd.f32 %v2957_v10, %v2786_v51  ;;  %v2543_v60 = vpop.f32.mrb[1].mxu0 }
 0xbd8   : > { %v2544_v63 = vadd.f32 %v2786_v51, %v2543_v60  ;;  %v2958_v39 = vpop.f32.mrb[2].mxu0 }
 0xbd9   : > { %2560 = vst [vmem:[%s3915_s26 + $0x10] sm:$0xff] %v2552_v59  ;;  %v2555_v61 = vadd.f32 %v2958_v39, %v2786_v51  ;;  %v2546_v43 = vpop.f32.mrb[3].mxu0 }
 0xbda   : > { %2558 = vst [vmem:[%s3915_s26] sm:$0xff] %v2544_v63  ;;  %v2547_v62 = vadd.f32 %v2786_v51, %v2546_v43 }
 0xbdb   : > { %2561 = vst [vmem:[%s3915_s26 + $0x18] sm:$0xff] %v2555_v61 }
 0xbdc   : > { %2559 = vst [vmem:[%s3915_s26 + $0x8] sm:$0xff] %v2547_v62 }
 0xbdd PF: > { %s3916_s5 = sld [smem:[#allocation4_spill]] }
 0xbe3   : > { %s28_s27 = sadd.s32 1, %s3916_s5  }
 0xbe4   : > { %p25_p6 = scmp.ge.s32.totalorder %s28_s27, 4  }
 0xbe6   :  { %27 = sbr.rel (!%p25_p6) target bundleno = 11 (0xb), region = 159 }

</bundles_post_ra>
